<compile_context>
chip_gen: v6e
topology: v6e:2x2x1
jax: 0.10.0
libtpu: 0.0.40
codegen_flags: <defaults>
</compile_context>

<pallas_src>
import functools

import jax
import jax.numpy as jnp
from jax.experimental import pallas as pl
from jax.experimental.pallas import tpu as pltpu


def _round_up(x, m):
    return (x + m - 1) // m * m


_MAX_TILE_B = 512  # cap: bf16 feature tiles (x2 buffers) + weights stay well inside v7x VMEM


def _choose_tile_b(B):
    """Batch-tile heuristic: minimal padding, >=2 grid steps when B allows
    (so ('parallel',) uses both v7x TensorCores), 16-row floor (bf16 sublane
    packing), multiples of 128 for large B (v5e 4x128 MXU)."""
    if B <= 128:
        return _round_up(B, 16)
    if B <= 2 * _MAX_TILE_B:
        return _round_up(pl.cdiv(B, 2), 16)
    n_tiles = pl.cdiv(B, _MAX_TILE_B)
    return _round_up(pl.cdiv(B, n_tiles), 128)


# -----------------------------------------------------------------------------
# Fused multi-task head kernel (one batch tile per grid step):
#   classifier : Linear(1536,512) -> ReLU -> [Dropout] -> Linear(512,256) -> ReLU -> [Dropout]
#   fused head : Linear(256, 128+128) = [fc_type (padded) | fc_severity[0]]
#   fc_severity: ReLU -> [Dropout] -> Linear(128, num_severity padded to 128)
# -----------------------------------------------------------------------------
def _multitask_head_kernel(
    x_ref,               # (TILE_B, 1536) bf16
    w1_ref, b1_ref,      # (1536, 512) bf16, (1, 512) f32
    w2_ref, b2_ref,      # (512, 256)  bf16, (1, 256) f32
    wcat_ref, bcat_ref,  # (256, 256)  bf16, (1, 256) f32  [type_pad | sev_hidden]
    ws2_ref, bs2_ref,    # (128, 128)  bf16, (1, 128) f32  (zero-padded cols)
    out_ref,             # (TILE_B, 256) f32: lanes 0..127 type, 128..255 severity
):
    x = x_ref[...]  # already bf16

    # classifier block (Dropout p=0.4 / p=0.3 -> identity in eval)
    h1 = jnp.dot(x, w1_ref[...], preferred_element_type=jnp.float32) + b1_ref[...]
    h1 = jnp.maximum(h1, 0.0).astype(jnp.bfloat16)
    h2 = jnp.dot(h1, w2_ref[...], preferred_element_type=jnp.float32) + b2_ref[...]
    h2 = jnp.maximum(h2, 0.0).astype(jnp.bfloat16)

    # fused fc_type + fc_severity stage-1: one lane-full N=256 matmul
    fused = jnp.dot(h2, wcat_ref[...], preferred_element_type=jnp.float32) + bcat_ref[...]

    # fc_severity stage-2 (Dropout p=0.3 -> identity in eval)
    s1 = jnp.maximum(fused[:, 128:], 0.0).astype(jnp.bfloat16)
    sev = jnp.dot(s1, ws2_ref[...], preferred_element_type=jnp.float32) + bs2_ref[...]

    # single lane-dense 256-wide store: [type logits (padded) | severity logits (padded)]
    out_ref[...] = jnp.concatenate([fused[:, :128], sev], axis=-1)


def multitask_head(features, packed, *, num_types, num_severity):
    """features: (B, 1536) float. packed: dict from pack_params().

    Returns (type_logits (B, num_types), severity_logits (B, num_severity))."""
    B = features.shape[0]
    TILE_B = _choose_tile_b(B)
    B_pad = _round_up(B, TILE_B)

    x = features.astype(jnp.bfloat16)          # halve feature DMA / VMEM
    if B_pad != B:
        x = jnp.pad(x, ((0, B_pad - B), (0, 0)))
    grid = (B_pad // TILE_B,)

    def const_spec(shape):
        return pl.BlockSpec(shape, lambda i: (0, 0))   # weights: VMEM-resident

    out = pl.pallas_call(
        _multitask_head_kernel,
        out_shape=jax.ShapeDtypeStruct((B_pad, 256), jnp.float32),
        grid=grid,
        in_specs=[
            pl.BlockSpec((TILE_B, 1536), lambda i: (i, 0)),  # feature tile pipelines
            const_spec((1536, 512)), const_spec((1, 512)),
            const_spec((512, 256)), const_spec((1, 256)),
            const_spec((256, 256)), const_spec((1, 256)),
            const_spec((128, 128)), const_spec((1, 128)),
        ],
        out_specs=pl.BlockSpec((TILE_B, 256), lambda i: (i, 0)),
        compiler_params=pltpu.CompilerParams(
            dimension_semantics=("parallel",),
            vmem_limit_bytes=32 * 1024 * 1024,
        ),
    )(x,
      packed["w1"], packed["b1"],
      packed["w2"], packed["b2"],
      packed["wcat"], packed["bcat"],
      packed["ws2"], packed["bs2"])

    type_logits = out[:B, :num_types]
    sev_logits = out[:B, 128:128 + num_severity]
    return type_logits, sev_logits


# -----------------------------------------------------------------------------
# Deterministic parameter init (shapes from the module __init__; synthetic, no
# checkpoint load). Weights stored as (in, out) = PyTorch weight transposed.
# -----------------------------------------------------------------------------
def init_params(key, num_types, num_severity):
    def linear(key, fan_in, fan_out):
        kw, kb = jax.random.split(key)
        bound = 1.0 / jnp.sqrt(fan_in)
        w = jax.random.uniform(kw, (fan_in, fan_out), jnp.float32, -bound, bound)
        b = jax.random.uniform(kb, (1, fan_out), jnp.float32, -bound, bound)
        return w, b

    keys = jax.random.split(key, 5)
    w1, b1 = linear(keys[0], 1536, 512)
    w2, b2 = linear(keys[1], 512, 256)
    wt, bt = linear(keys[2], 256, num_types)
    ws1, bs1 = linear(keys[3], 256, 128)
    ws2, bs2 = linear(keys[4], 128, num_severity)
    return dict(w1=w1, b1=b1, w2=w2, b2=b2, wt=wt, bt=bt,
                ws1=ws1, bs1=bs1, ws2=ws2, bs2=bs2)


def pack_params(p):
    """bf16-cast weights, fuse fc_type + fc_severity[0], pad heads to 128 lanes."""
    num_types = p["wt"].shape[1]
    num_severity = p["ws2"].shape[1]
    assert num_types <= 128 and num_severity <= 128

    def pad_cols(a, width):
        return jnp.pad(a, ((0, 0), (0, width - a.shape[1])))

    wcat = jnp.concatenate([pad_cols(p["wt"], 128), p["ws1"]], axis=1)   # (256, 256)
    bcat = jnp.concatenate([pad_cols(p["bt"], 128), p["bs1"]], axis=1)   # (1, 256)
    ws2 = pad_cols(p["ws2"], 128)                                        # (128, 128)
    bs2 = pad_cols(p["bs2"], 128)                                        # (1, 128)

    bf16 = lambda a: a.astype(jnp.bfloat16)
    return dict(
        w1=bf16(p["w1"]), b1=p["b1"],
        w2=bf16(p["w2"]), b2=p["b2"],
        wcat=bf16(wcat), bcat=bcat,
        ws2=bf16(ws2), bs2=bs2,
    )


def _reference(features, p):
    h1 = jnp.maximum(features @ p["w1"] + p["b1"], 0.0)
    h2 = jnp.maximum(h1 @ p["w2"] + p["b2"], 0.0)
    t = h2 @ p["wt"] + p["bt"]
    s1 = jnp.maximum(h2 @ p["ws1"] + p["bs1"], 0.0)
    s = s1 @ p["ws2"] + p["bs2"]
    return t, s


if __name__ == "__main__":
    num_types, num_severity = 5, 3
    B = 8

    key = jax.random.PRNGKey(0)
    k_feat, k_params = jax.random.split(key)

    # Backbone (EfficientNet-B3) output features: (B, 1536).
    features = jax.random.normal(k_feat, (B, 1536), jnp.float32)
    params = init_params(k_params, num_types, num_severity)
    packed = pack_params(params)

    head = jax.jit(functools.partial(
        multitask_head, num_types=num_types, num_severity=num_severity))
    type_logits, sev_logits = head(features, packed)
    jax.block_until_ready((type_logits, sev_logits))

    # correctness check against plain-JAX f32 reference (bf16 features, weights
    # and inter-layer activations in the kernel -> loosened tolerance)
    t_ref, s_ref = _reference(features, params)
    assert type_logits.shape == (B, num_types)
    assert sev_logits.shape == (B, num_severity)
    assert jnp.allclose(type_logits, t_ref, atol=3e-2, rtol=3e-2), (
        float(jnp.max(jnp.abs(type_logits - t_ref))))
    assert jnp.allclose(sev_logits, s_ref, atol=3e-2, rtol=3e-2), (
        float(jnp.max(jnp.abs(sev_logits - s_ref))))

    print("KERNEL_OK")
</pallas_src>

<mosaic_0001>
module attributes {stable_mosaic.version = 11 : i64} {
  func.func @_multitask_head_kernel(%arg0: i32, %arg1: memref<16x1536xbf16, #tpu.memory_space<vmem>>, %arg2: memref<1536x512xbf16, #tpu.memory_space<vmem>>, %arg3: memref<1x512xf32, #tpu.memory_space<vmem>>, %arg4: memref<512x256xbf16, #tpu.memory_space<vmem>>, %arg5: memref<1x256xf32, #tpu.memory_space<vmem>>, %arg6: memref<256x256xbf16, #tpu.memory_space<vmem>>, %arg7: memref<1x256xf32, #tpu.memory_space<vmem>>, %arg8: memref<128x128xbf16, #tpu.memory_space<vmem>>, %arg9: memref<1x128xf32, #tpu.memory_space<vmem>>, %arg10: memref<16x256xf32, #tpu.memory_space<vmem>>) attributes {dimension_semantics = [#tpu.dimension_semantics<parallel>], iteration_bounds = array<i64: 1>, scalar_prefetch = 0 : i64, scratch_operands = 0 : i64, tpu.core_type = #tpu.core_type<tc>, window_params = [{transform_indices = @transform_0, window_bounds = array<i64: 16, 1536>}, {pipeline_mode = #tpu.pipeline_mode<synchronous>, transform_indices = @transform_1, window_bounds = array<i64: 1536, 512>}, {pipeline_mode = #tpu.pipeline_mode<synchronous>, transform_indices = @transform_2, window_bounds = array<i64: 1, 512>}, {pipeline_mode = #tpu.pipeline_mode<synchronous>, transform_indices = @transform_3, window_bounds = array<i64: 512, 256>}, {pipeline_mode = #tpu.pipeline_mode<synchronous>, transform_indices = @transform_4, window_bounds = array<i64: 1, 256>}, {pipeline_mode = #tpu.pipeline_mode<synchronous>, transform_indices = @transform_5, window_bounds = array<i64: 256, 256>}, {pipeline_mode = #tpu.pipeline_mode<synchronous>, transform_indices = @transform_6, window_bounds = array<i64: 1, 256>}, {pipeline_mode = #tpu.pipeline_mode<synchronous>, transform_indices = @transform_7, window_bounds = array<i64: 128, 128>}, {pipeline_mode = #tpu.pipeline_mode<synchronous>, transform_indices = @transform_8, window_bounds = array<i64: 1, 128>}, {transform_indices = @transform_9, window_bounds = array<i64: 16, 256>}]} {
    %c0 = arith.constant 0 : index
    %c0_0 = arith.constant 0 : index
    %0 = vector.load %arg1[%c0, %c0_0] : memref<16x1536xbf16, #tpu.memory_space<vmem>>, vector<16x1536xbf16>
    %c0_1 = arith.constant 0 : index
    %c0_2 = arith.constant 0 : index
    %1 = vector.load %arg2[%c0_1, %c0_2] : memref<1536x512xbf16, #tpu.memory_space<vmem>>, vector<1536x512xbf16>
    %cst = arith.constant dense<0.000000e+00> : vector<16x512xf32>
    %2 = tpu.matmul %0, %1, %cst {dimension_numbers = #tpu.dot_dimension_numbers<[1], [0], [0], [1], [0, 0, 1, 1], [], []>} : vector<16x1536xbf16>, vector<1536x512xbf16>, vector<16x512xf32> -> vector<16x512xf32>
    %c0_3 = arith.constant 0 : index
    %c0_4 = arith.constant 0 : index
    %3 = vector.load %arg3[%c0_3, %c0_4] : memref<1x512xf32, #tpu.memory_space<vmem>>, vector<1x512xf32>
    %4 = vector.broadcast %3 : vector<1x512xf32> to vector<16x512xf32>
    %5 = arith.addf %2, %4 : vector<16x512xf32>
    %cst_5 = arith.constant 0.000000e+00 : f32
    %6 = vector.broadcast %cst_5 : f32 to vector<16x512xf32>
    %7 = arith.maximumf %5, %6 : vector<16x512xf32>
    %8 = arith.truncf %7 : vector<16x512xf32> to vector<16x512xbf16>
    %c0_6 = arith.constant 0 : index
    %c0_7 = arith.constant 0 : index
    %9 = vector.load %arg4[%c0_6, %c0_7] : memref<512x256xbf16, #tpu.memory_space<vmem>>, vector<512x256xbf16>
    %cst_8 = arith.constant dense<0.000000e+00> : vector<16x256xf32>
    %10 = tpu.matmul %8, %9, %cst_8 {dimension_numbers = #tpu.dot_dimension_numbers<[1], [0], [0], [1], [0, 0, 1, 1], [], []>} : vector<16x512xbf16>, vector<512x256xbf16>, vector<16x256xf32> -> vector<16x256xf32>
    %c0_9 = arith.constant 0 : index
    %c0_10 = arith.constant 0 : index
    %11 = vector.load %arg5[%c0_9, %c0_10] : memref<1x256xf32, #tpu.memory_space<vmem>>, vector<1x256xf32>
    %12 = vector.broadcast %11 : vector<1x256xf32> to vector<16x256xf32>
    %13 = arith.addf %10, %12 : vector<16x256xf32>
    %cst_11 = arith.constant 0.000000e+00 : f32
    %14 = vector.broadcast %cst_11 : f32 to vector<16x256xf32>
    %15 = arith.maximumf %13, %14 : vector<16x256xf32>
    %16 = arith.truncf %15 : vector<16x256xf32> to vector<16x256xbf16>
    %c0_12 = arith.constant 0 : index
    %c0_13 = arith.constant 0 : index
    %17 = vector.load %arg6[%c0_12, %c0_13] : memref<256x256xbf16, #tpu.memory_space<vmem>>, vector<256x256xbf16>
    %cst_14 = arith.constant dense<0.000000e+00> : vector<16x256xf32>
    %18 = tpu.matmul %16, %17, %cst_14 {dimension_numbers = #tpu.dot_dimension_numbers<[1], [0], [0], [1], [0, 0, 1, 1], [], []>} : vector<16x256xbf16>, vector<256x256xbf16>, vector<16x256xf32> -> vector<16x256xf32>
    %c0_15 = arith.constant 0 : index
    %c0_16 = arith.constant 0 : index
    %19 = vector.load %arg7[%c0_15, %c0_16] : memref<1x256xf32, #tpu.memory_space<vmem>>, vector<1x256xf32>
    %20 = vector.broadcast %19 : vector<1x256xf32> to vector<16x256xf32>
    %21 = arith.addf %18, %20 : vector<16x256xf32>
    %22 = vector.extract_strided_slice %21 {offsets = [0, 128], sizes = [16, 128], strides = [1, 1]} : vector<16x256xf32> to vector<16x128xf32>
    %cst_17 = arith.constant 0.000000e+00 : f32
    %23 = vector.broadcast %cst_17 : f32 to vector<16x128xf32>
    %24 = arith.maximumf %22, %23 : vector<16x128xf32>
    %25 = arith.truncf %24 : vector<16x128xf32> to vector<16x128xbf16>
    %c0_18 = arith.constant 0 : index
    %c0_19 = arith.constant 0 : index
    %26 = vector.load %arg8[%c0_18, %c0_19] : memref<128x128xbf16, #tpu.memory_space<vmem>>, vector<128x128xbf16>
    %cst_20 = arith.constant dense<0.000000e+00> : vector<16x128xf32>
    %27 = tpu.matmul %25, %26, %cst_20 {dimension_numbers = #tpu.dot_dimension_numbers<[1], [0], [0], [1], [0, 0, 1, 1], [], []>} : vector<16x128xbf16>, vector<128x128xbf16>, vector<16x128xf32> -> vector<16x128xf32>
    %c0_21 = arith.constant 0 : index
    %c0_22 = arith.constant 0 : index
    %28 = vector.load %arg9[%c0_21, %c0_22] : memref<1x128xf32, #tpu.memory_space<vmem>>, vector<1x128xf32>
    %29 = vector.broadcast %28 : vector<1x128xf32> to vector<16x128xf32>
    %30 = arith.addf %27, %29 : vector<16x128xf32>
    %31 = vector.extract_strided_slice %21 {offsets = [0, 0], sizes = [16, 128], strides = [1, 1]} : vector<16x256xf32> to vector<16x128xf32>
    %32 = tpu.concatenate %31, %30 in 1 : vector<16x128xf32>, vector<16x128xf32> -> vector<16x256xf32>
    %c0_23 = arith.constant 0 : index
    %c0_24 = arith.constant 0 : index
    %33 = vector.load %arg10[%c0_23, %c0_24] : memref<16x256xf32, #tpu.memory_space<vmem>>, vector<16x256xf32>
    tpu.vector_store %arg10[%c0_23, %c0_24], %32 {strides = array<i32>} : memref<16x256xf32, #tpu.memory_space<vmem>>, vector<16x256xf32>,
    return
  }
  func.func @transform_0(%arg0: i32) -> (i32, i32) {
    %c0_i32 = arith.constant 0 : i32
    %c0_i32_0 = arith.constant 0 : i32
    return %arg0, %c0_i32 : i32, i32
  }
  func.func @transform_1(%arg0: i32) -> (i32, i32) {
    %c0_i32 = arith.constant 0 : i32
    %c0_i32_0 = arith.constant 0 : i32
    %c0_i32_1 = arith.constant 0 : i32
    return %c0_i32, %c0_i32_0 : i32, i32
  }
  func.func @transform_2(%arg0: i32) -> (i32, i32) {
    %c0_i32 = arith.constant 0 : i32
    %c0_i32_0 = arith.constant 0 : i32
    %c0_i32_1 = arith.constant 0 : i32
    return %c0_i32, %c0_i32_0 : i32, i32
  }
  func.func @transform_3(%arg0: i32) -> (i32, i32) {
    %c0_i32 = arith.constant 0 : i32
    %c0_i32_0 = arith.constant 0 : i32
    %c0_i32_1 = arith.constant 0 : i32
    return %c0_i32, %c0_i32_0 : i32, i32
  }
  func.func @transform_4(%arg0: i32) -> (i32, i32) {
    %c0_i32 = arith.constant 0 : i32
    %c0_i32_0 = arith.constant 0 : i32
    %c0_i32_1 = arith.constant 0 : i32
    return %c0_i32, %c0_i32_0 : i32, i32
  }
  func.func @transform_5(%arg0: i32) -> (i32, i32) {
    %c0_i32 = arith.constant 0 : i32
    %c0_i32_0 = arith.constant 0 : i32
    %c0_i32_1 = arith.constant 0 : i32
    return %c0_i32, %c0_i32_0 : i32, i32
  }
  func.func @transform_6(%arg0: i32) -> (i32, i32) {
    %c0_i32 = arith.constant 0 : i32
    %c0_i32_0 = arith.constant 0 : i32
    %c0_i32_1 = arith.constant 0 : i32
    return %c0_i32, %c0_i32_0 : i32, i32
  }
  func.func @transform_7(%arg0: i32) -> (i32, i32) {
    %c0_i32 = arith.constant 0 : i32
    %c0_i32_0 = arith.constant 0 : i32
    %c0_i32_1 = arith.constant 0 : i32
    return %c0_i32, %c0_i32_0 : i32, i32
  }
  func.func @transform_8(%arg0: i32) -> (i32, i32) {
    %c0_i32 = arith.constant 0 : i32
    %c0_i32_0 = arith.constant 0 : i32
    %c0_i32_1 = arith.constant 0 : i32
    return %c0_i32, %c0_i32_0 : i32, i32
  }
  func.func @transform_9(%arg0: i32) -> (i32, i32) {
    %c0_i32 = arith.constant 0 : i32
    %c0_i32_0 = arith.constant 0 : i32
    return %arg0, %c0_i32 : i32, i32
  }
}

</mosaic_0001>

<bundles_post_ra>
// kernel: multitask_head.1
= control target key start
LH: loop header
LB: loop body
LE: loop exit
PB: predicated region body
PF: predicated region fallthrough
CT: control target
= control target key end

     0   :  { %14 = vsyncpa [#allocation3], 0  ;;  %s5629_s0 = inlined_call_operand.vmem [shape: bf16[16,1536], index: 0, kind: input, shape index: {}]   ;;  %s5630_s1 = inlined_call_operand.hbm [shape: bf16[1536,512], index: 1, kind: input, shape index: {}]   ;;  %s5631_s2 = inlined_call_operand.hbm [shape: f32[1,512], index: 2, kind: input, shape index: {}]   ;;  %s5632_s3 = inlined_call_operand.hbm [shape: bf16[512,256], index: 3, kind: input, shape index: {}]   ;;  %s5633_s4 = inlined_call_operand.hbm [shape: f32[1,256], index: 4, kind: input, shape index: {}]   ;;  %s5634_s5 = inlined_call_operand.hbm [shape: bf16[256,256], index: 5, kind: input, shape index: {}]   ;;  %s5635_s6 = inlined_call_operand.hbm [shape: f32[1,256], index: 6, kind: input, shape index: {}]   ;;  %s5636_s7 = inlined_call_operand.hbm [shape: bf16[128,128], index: 7, kind: input, shape index: {}]   ;;  %s5637_s8 = inlined_call_operand.hbm [shape: f32[1,128], index: 8, kind: input, shape index: {}]   ;;  %s5638_s9 = inlined_call_operand.vmem [shape: f32[16,256], index: 9, kind: output, shape index: {}]  }
   0x1   :  { %15 = vsyncpa [#allocation5], 0 }
   0x2   :  { %16 = vsyncpa [#allocation8], 0 }
   0x3   :  { %17 = vsyncpa [#allocation11], 0 }
   0x4   :  { %18 = vsyncpa [#allocation14], 0  ;;  %s5397_s30 = smov [#allocation4]   ;;  %s5398_s11 = smov [#allocation7]  }
   0x5   :  { %s39_s10 = sshll.u32 %s5397_s30, 4  ;;  %s61_s12 = sshll.u32 %s5398_s11, 4  ;;  %s40_s10 = int_to_ptr.vmem [resolvable:$true] %s39_s10  ;;  %s62_s12 = int_to_ptr.vmem [resolvable:$true] %s61_s12 }
   0x6   :  { %s5235_s13 = scalar_lea.vmem %s40_s10, 64  ;;  %p5240_p1 = scmp.lt.s32.totalorder %s40_s10, %s40_s10 }
   0x7   :  { %p5236_p0 = scmp.ne.s32.totalorder %s40_s10, %s5235_s13  ;;  %p5241_p2 = scmp.lt.s32.totalorder %s5235_s13, %s5235_s13 }
   0x9   :  { %p5242_p3 = por %p5241_p2, %p5240_p1 }
   0xb   :  { %p5243_p4 = pnand %p5242_p3, %p5236_p0 }
   0xd   :  { %5246 = shalt.err (!%p5243_p4)
}
   0xe   :  { %42 = dma.hbm_to_vmem [thread:$0]  %s5631_s2, 64, %s40_s10, [#allocation5]  }
   0xf   :  { %s5255_s16 = scalar_lea.vmem %s62_s12, 32  ;;  %p5260_p6 = scmp.lt.s32.totalorder %s62_s12, %s62_s12 }
  0x10   :  { %p5256_p5 = scmp.ne.s32.totalorder %s62_s12, %s5255_s16  ;;  %p5261_p7 = scmp.lt.s32.totalorder %s5255_s16, %s5255_s16 }
  0x12   :  { %p5262_p8 = por %p5261_p7, %p5260_p6 }
  0x14   :  { %p5263_p9 = pnand %p5262_p8, %p5256_p5 }
  0x16   :  { %5266 = shalt.err (!%p5263_p9)
}
  0x17   :  { %64 = dma.hbm_to_vmem [thread:$0]  %s5633_s4, 32, %s62_s12, [#allocation8]  }
  0x18   :  { %s5399_s19 = smov [#allocation10]   ;;  %s5400_s21 = smov [#allocation2]  }
  0x19   :  { %s83_s20 = sshll.u32 %s5399_s19, 4  ;;  %s26_s22 = sshll.u32 %s5400_s21, 4  ;;  %s84_s20 = int_to_ptr.vmem [resolvable:$true] %s83_s20  ;;  %s27_s22 = int_to_ptr.vmem [resolvable:$true] %s26_s22 }
  0x1a   :  { %s5275_s23 = scalar_lea.vmem %s84_s20, 32  ;;  %p5280_p11 = scmp.lt.s32.totalorder %s84_s20, %s84_s20 }
  0x1b   :  { %p5276_p10 = scmp.ne.s32.totalorder %s84_s20, %s5275_s23  ;;  %p5281_p12 = scmp.lt.s32.totalorder %s5275_s23, %s5275_s23 }
  0x1d   :  { %p5282_p13 = por %p5281_p12, %p5280_p11 }
  0x1f   :  { %p5283_p0 = pnand %p5282_p13, %p5276_p10 }
  0x21   :  { %5286 = shalt.err (!%p5283_p0)
}
  0x22   :  { %86 = dma.hbm_to_vmem [thread:$0]  %s5635_s6, 32, %s84_s20, [#allocation11]  }
  0x23   :  { %s5295_s25 = scalar_lea.vmem %s27_s22, 49152  ;;  %p5300_p2 = scmp.lt.s32.totalorder %s27_s22, %s27_s22 }
  0x24   :  { %p5296_p1 = scmp.ne.s32.totalorder %s27_s22, %s5295_s25  ;;  %p5301_p3 = scmp.lt.s32.totalorder %s5295_s25, %s5295_s25 }
  0x26   :  { %p5302_p4 = por %p5301_p3, %p5300_p2 }
  0x28   :  { %p5303_p5 = pnand %p5302_p4, %p5296_p1 }
  0x2a   :  { %5306 = shalt.err (!%p5303_p5)
}
  0x2b   :  { %s5401_s4 = smov 256   ;;  %s5402_s26 = smov 16  }
  0x2c   :  { %32 = dma.hbm_to_vmem [thread:$0]  %s5630_s1, 49152, %s27_s22, [#allocation3], %s5401_s4, %s5401_s4, %s5402_s26  }
  0x2d   :  { %s5403_s29 = smov [#allocation6]  }
  0x2e   :  { %s48_s30 = sshll.u32 %s5403_s29, 4  ;;  %s49_s30 = int_to_ptr.vmem [resolvable:$true] %s48_s30 }
  0x2f   :  { %s5315_s10 = scalar_lea.vmem %s49_s30, 8192  ;;  %p5320_p7 = scmp.lt.s32.totalorder %s49_s30, %s49_s30 }
  0x30   :  { %p5316_p6 = scmp.ne.s32.totalorder %s49_s30, %s5315_s10  ;;  %p5321_p8 = scmp.lt.s32.totalorder %s5315_s10, %s5315_s10 }
  0x32   :  { %p5322_p9 = por %p5321_p8, %p5320_p7 }
  0x34   :  { %p5323_p10 = pnand %p5322_p9, %p5316_p6 }
  0x36   :  { %5326 = shalt.err (!%p5323_p10)
}
  0x37   :  { %s5404_s6 = smov 128   ;;  %s5405_s11 = smov 8  }
  0x38   :  { %54 = dma.hbm_to_vmem [thread:$0]  %s5632_s3, 8192, %s49_s30, [#allocation5], %s5404_s6, %s5404_s6, %s5405_s11  }
  0x39   :  { %s5406_s14 = smov [#allocation9]   ;;  %s5407_s1 = smov [#allocation12]  }
  0x3a   :  { %s70_s15 = sshll.u32 %s5406_s14, 4  ;;  %s92_s16 = sshll.u32 %s5407_s1, 4  ;;  %s71_s15 = int_to_ptr.vmem [resolvable:$true] %s70_s15  ;;  %s93_s16 = int_to_ptr.vmem [resolvable:$true] %s92_s16 }
  0x3b   :  { %s5335_s17 = scalar_lea.vmem %s71_s15, 4096  ;;  %p5340_p12 = scmp.lt.s32.totalorder %s71_s15, %s71_s15 }
  0x3c   :  { %p5336_p11 = scmp.ne.s32.totalorder %s71_s15, %s5335_s17  ;;  %p5341_p13 = scmp.lt.s32.totalorder %s5335_s17, %s5335_s17 }
  0x3e   :  { %p5342_p0 = por %p5341_p13, %p5340_p12 }
  0x40   :  { %p5343_p1 = pnand %p5342_p0, %p5336_p11 }
  0x42   :  { %5346 = shalt.err (!%p5343_p1)
}
  0x43   :  { %76 = dma.hbm_to_vmem [thread:$0]  %s5634_s5, 4096, %s71_s15, [#allocation8], %s5404_s6, %s5404_s6, %s5405_s11  }
  0x44   :  { %s5355_s20 = scalar_lea.vmem %s93_s16, 1024  ;;  %p5360_p3 = scmp.lt.s32.totalorder %s93_s16, %s93_s16 }
  0x45   :  { %p5356_p2 = scmp.ne.s32.totalorder %s93_s16, %s5355_s20  ;;  %p5361_p4 = scmp.lt.s32.totalorder %s5355_s20, %s5355_s20 }
  0x47   :  { %p5362_p5 = por %p5361_p4, %p5360_p3 }
  0x49   :  { %p5363_p6 = pnand %p5362_p5, %p5356_p2 }
  0x4b   :  { %5366 = shalt.err (!%p5363_p6)
}
  0x4c   :  { %s5408_s3 = smov 64   ;;  %s5409_s21 = smov 4  }
  0x4d   :  { %98 = dma.hbm_to_vmem [thread:$0]  %s5636_s7, 1024, %s93_s16, [#allocation11], %s5408_s3, %s5408_s3, %s5409_s21  }
  0x4e   :  { %s5410_s2 = smov [#allocation13]  }
  0x4f   :  { %s105_s24 = sshll.u32 %s5410_s2, 4  ;;  %s106_s24 = int_to_ptr.vmem [resolvable:$true] %s105_s24 }
  0x50   :  { %s5375_s25 = scalar_lea.vmem %s106_s24, 16  ;;  %s5379_s5 = scalar_lea.vmem %s106_s24, 32 }
  0x51   :  { %p5376_p7 = scmp.ne.s32.totalorder %s106_s24, %s5375_s25  ;;  %p5380_p8 = scmp.lt.s32.totalorder %s106_s24, %s106_s24 }
  0x52   :  { %p5381_p9 = scmp.lt.s32.totalorder %s5379_s5, %s5375_s25 }
  0x54   :  { %p5382_p10 = por %p5381_p9, %p5380_p8 }
  0x56   :  { %p5383_p11 = pnand %p5382_p10, %p5376_p7 }
  0x58   :  { %5386 = shalt.err (!%p5383_p11)
}
  0x59   :  { %108 = dma.hbm_to_vmem [thread:$0]  %s5637_s8, 16, %s106_s24, [#allocation14]  }
  0x5a   :  { %5387 = dma.done.wait [#allocation3], 49152  }
  0x5b   :  { %5388 = vsyncadd [#allocation3], 4294918144 }
  0x5c   :  { %5389 = dma.done.wait [#allocation5], 8256  }
  0x5d   :  { %5390 = vsyncadd [#allocation5], 4294959040 }
  0x5e   :  { %5391 = dma.done.wait [#allocation8], 4128  }
  0x5f   :  { %5392 = vsyncadd [#allocation8], 4294963168 }
  0x60   :  { %5393 = dma.done.wait [#allocation11], 1056  }
  0x61   :  { %5394 = vsyncadd [#allocation11], 4294966240 }
  0x62   :  { %5395 = dma.done.wait [#allocation14], 16  }
  0x63   :  { %5396 = vsyncadd [#allocation14], 4294967280  ;;  %v4469_v0 = vld [vmem:[#allocation2 + $0xe4] ss:$16 sps:$4 sm:$0xff]   ;;  %v4473_v2 = vld [vmem:[#allocation2 + $0xe0] ss:$16 sps:$4 sm:$0xff]  }
  0x64   :  { %v4471_v1 = vld [vmem:[#allocation2 + $0x2e4] ss:$16 sps:$4 sm:$0xff]   ;;  %2532 = vmatprep.subr.bf16.mxu0 %v4469_v0  ;;  %v4474_v3 = vld [vmem:[#allocation2 + $0x2e0] ss:$16 sps:$4 sm:$0xff]   ;;  %v4570_v51 = vld [vmem:[%s5629_s0 + $0xc] ss:$48 sps:$4 sm:$0xff]  }
  0x65   :  { %2575 = vmatprep.subr.bf16.mxu1 %v4471_v1  ;;  %v4475_v4 = vld [vmem:[#allocation2 + $0xc4] ss:$16 sps:$4 sm:$0xff]   ;;  %2533 = vmatpush1.bf16.msra.mxu0 %v4473_v2  ;;  %v4479_v6 = vld [vmem:[#allocation2 + $0xc0] ss:$16 sps:$4 sm:$0xff]   ;;  %vm5412_vm0 = vmmov 0  }
  0x66   :  { %2576 = vmatpush1.bf16.msra.mxu1 %v4474_v3  ;;  %v4477_v5 = vld [vmem:[#allocation2 + $0x2c4] ss:$16 sps:$4 sm:$0xff]   ;;  %2534 = vmatprep.subr.bf16.mxu0 %v4475_v4  ;;  %v4480_v7 = vld [vmem:[#allocation2 + $0x2c0] ss:$16 sps:$4 sm:$0xff]  }
  0x67   :  { %2577 = vmatprep.subr.bf16.mxu1 %v4477_v5  ;;  %v4481_v8 = vld [vmem:[#allocation2 + $0xa4] ss:$16 sps:$4 sm:$0xff]   ;;  %v4485_v10 = vld [vmem:[#allocation2 + $0xa0] ss:$16 sps:$4 sm:$0xff]   ;;  %2607 = vmatprep.mubr.bf16.mxu1 %v4570_v51  ;;  %v4568_v5 = vld [vmem:[%s5629_s0 + $0x8] ss:$48 sps:$4 sm:$0xff]  }
  0x68   :  { %v4483_v9 = vld [vmem:[#allocation2 + $0x2a4] ss:$16 sps:$4 sm:$0xff]   ;;  %v4486_v11 = vld [vmem:[#allocation2 + $0x2a0] ss:$16 sps:$4 sm:$0xff]  }
  0x69   :  { %2535 = vmatpush1.bf16.msra.mxu0 %v4479_v6  ;;  %v4487_v12 = vld [vmem:[#allocation2 + $0x84] ss:$16 sps:$4 sm:$0xff]   ;;  %v4491_v14 = vld [vmem:[#allocation2 + $0x80] ss:$16 sps:$4 sm:$0xff]  }
  0x6a   :  { %2578 = vmatpush1.bf16.msra.mxu1 %v4480_v7  ;;  %2536 = vmatprep.subr.bf16.mxu0 %v4481_v8  ;;  %v4489_v13 = vld [vmem:[#allocation2 + $0x284] ss:$16 sps:$4 sm:$0xff]   ;;  %v4492_v15 = vld [vmem:[#allocation2 + $0x280] ss:$16 sps:$4 sm:$0xff]  }
  0x6b   :  { %2579 = vmatprep.subr.bf16.mxu1 %v4483_v9  ;;  %v4493_v16 = vld [vmem:[#allocation2 + $0x64] ss:$16 sps:$4 sm:$0xff]   ;;  %v4497_v18 = vld [vmem:[#allocation2 + $0x60] ss:$16 sps:$4 sm:$0xff]  }
  0x6c   :  { %v4495_v17 = vld [vmem:[#allocation2 + $0x264] ss:$16 sps:$4 sm:$0xff]   ;;  %v4498_v19 = vld [vmem:[#allocation2 + $0x260] ss:$16 sps:$4 sm:$0xff]  }
  0x6d   :  { %2537 = vmatpush1.bf16.msra.mxu0 %v4485_v10  ;;  %v4499_v20 = vld [vmem:[#allocation2 + $0x44] ss:$16 sps:$4 sm:$0xff]   ;;  %v4503_v22 = vld [vmem:[#allocation2 + $0x40] ss:$16 sps:$4 sm:$0xff]  }
  0x6e   :  { %2580 = vmatpush1.bf16.msra.mxu1 %v4486_v11  ;;  %2538 = vmatprep.subr.bf16.mxu0 %v4487_v12  ;;  %v4501_v21 = vld [vmem:[#allocation2 + $0x244] ss:$16 sps:$4 sm:$0xff]   ;;  %v4504_v23 = vld [vmem:[#allocation2 + $0x240] ss:$16 sps:$4 sm:$0xff]  }
  0x6f   :  { %2581 = vmatprep.subr.bf16.mxu1 %v4489_v13  ;;  %v4505_v24 = vld [vmem:[#allocation2 + $0x24] ss:$16 sps:$4 sm:$0xff]   ;;  %v4509_v26 = vld [vmem:[#allocation2 + $0x20] ss:$16 sps:$4 sm:$0xff]  }
  0x70   :  { %v4507_v25 = vld [vmem:[#allocation2 + $0x224] ss:$16 sps:$4 sm:$0xff]   ;;  %v4510_v27 = vld [vmem:[#allocation2 + $0x220] ss:$16 sps:$4 sm:$0xff]  }
  0x71   :  { %2539 = vmatpush1.bf16.msra.mxu0 %v4491_v14  ;;  %v4511_v28 = vld [vmem:[#allocation2 + $0x4] ss:$16 sps:$4 sm:$0xff]   ;;  %v4515_v30 = vld [vmem:[#allocation2] ss:$16 sps:$4 sm:$0xff]  }
  0x72   :  { %2582 = vmatpush1.bf16.msra.mxu1 %v4492_v15  ;;  %2540 = vmatprep.subr.bf16.mxu0 %v4493_v16  ;;  %v4513_v29 = vld [vmem:[#allocation2 + $0x204] ss:$16 sps:$4 sm:$0xff]   ;;  %v4516_v31 = vld [vmem:[#allocation2 + $0x200] ss:$16 sps:$4 sm:$0xff]  }
  0x73   :  { %2583 = vmatprep.subr.bf16.mxu1 %v4495_v17  ;;  %v4517_v32 = vld [vmem:[#allocation2 + $0x1e4] ss:$16 sps:$4 sm:$0xff]   ;;  %v4521_v34 = vld [vmem:[#allocation2 + $0x1e0] ss:$16 sps:$4 sm:$0xff]  }
  0x74   :  { %v4519_v33 = vld [vmem:[#allocation2 + $0x3e4] ss:$16 sps:$4 sm:$0xff]   ;;  %v4522_v35 = vld [vmem:[#allocation2 + $0x3e0] ss:$16 sps:$4 sm:$0xff]  }
  0x75   :  { %2541 = vmatpush1.bf16.msra.mxu0 %v4497_v18  ;;  %v4523_v36 = vld [vmem:[#allocation2 + $0x1c4] ss:$16 sps:$4 sm:$0xff]   ;;  %v4527_v38 = vld [vmem:[#allocation2 + $0x1c0] ss:$16 sps:$4 sm:$0xff]  }
  0x76   :  { %2584 = vmatpush1.bf16.msra.mxu1 %v4498_v19  ;;  %2542 = vmatprep.subr.bf16.mxu0 %v4499_v20  ;;  %v4525_v37 = vld [vmem:[#allocation2 + $0x3c4] ss:$16 sps:$4 sm:$0xff]   ;;  %v4528_v39 = vld [vmem:[#allocation2 + $0x3c0] ss:$16 sps:$4 sm:$0xff]  }
  0x77   :  { %2585 = vmatprep.subr.bf16.mxu1 %v4501_v21  ;;  %v4529_v40 = vld [vmem:[#allocation2 + $0x1a4] ss:$16 sps:$4 sm:$0xff]   ;;  %v4533_v42 = vld [vmem:[#allocation2 + $0x1a0] ss:$16 sps:$4 sm:$0xff]  }
  0x78   :  { %v4531_v41 = vld [vmem:[#allocation2 + $0x3a4] ss:$16 sps:$4 sm:$0xff]   ;;  %v4534_v43 = vld [vmem:[#allocation2 + $0x3a0] ss:$16 sps:$4 sm:$0xff]  }
  0x79   :  { %2543 = vmatpush1.bf16.msra.mxu0 %v4503_v22  ;;  %v4535_v44 = vld [vmem:[#allocation2 + $0x184] ss:$16 sps:$4 sm:$0xff]   ;;  %v4539_v46 = vld [vmem:[#allocation2 + $0x180] ss:$16 sps:$4 sm:$0xff]  }
  0x7a   :  { %2586 = vmatpush1.bf16.msra.mxu1 %v4504_v23  ;;  %2544 = vmatprep.subr.bf16.mxu0 %v4505_v24  ;;  %v4537_v45 = vld [vmem:[#allocation2 + $0x384] ss:$16 sps:$4 sm:$0xff]   ;;  %v4540_v47 = vld [vmem:[#allocation2 + $0x380] ss:$16 sps:$4 sm:$0xff]  }
  0x7b   :  { %2587 = vmatprep.subr.bf16.mxu1 %v4507_v25  ;;  %v4541_v48 = vld [vmem:[#allocation2 + $0x164] ss:$16 sps:$4 sm:$0xff]   ;;  %v4545_v52 = vld [vmem:[#allocation2 + $0x160] ss:$16 sps:$4 sm:$0xff]  }
  0x7c   :  { %v4567_v49 = vld [vmem:[%s5629_s0 + $0x4] ss:$48 sps:$4 sm:$0xff]   ;;  %v4546_v53 = vld [vmem:[#allocation2 + $0x360] ss:$16 sps:$4 sm:$0xff]  }
  0x7d   :  { %2545 = vmatpush1.bf16.msra.mxu0 %v4509_v26  ;;  %v4543_v50 = vld [vmem:[#allocation2 + $0x364] ss:$16 sps:$4 sm:$0xff]   ;;  %2564 = vmatprep.mubr.bf16.mxu0 %v4567_v49  ;;  %v4551_v56 = vld [vmem:[#allocation2 + $0x140] ss:$16 sps:$4 sm:$0xff]  }
  0x7e   :  { %2588 = vmatpush1.bf16.msra.mxu1 %v4510_v27  ;;  %2546 = vmatprep.subr.bf16.mxu0 %v4511_v28  ;;  %v4547_v54 = vld [vmem:[#allocation2 + $0x144] ss:$16 sps:$4 sm:$0xff]   ;;  %v4552_v57 = vld [vmem:[#allocation2 + $0x340] ss:$16 sps:$4 sm:$0xff]  }
  0x7f   :  { %2589 = vmatprep.subr.bf16.mxu1 %v4513_v29  ;;  %v4549_v55 = vld [vmem:[#allocation2 + $0x344] ss:$16 sps:$4 sm:$0xff]   ;;  %v4557_v60 = vld [vmem:[#allocation2 + $0x120] ss:$16 sps:$4 sm:$0xff]  }
  0x80   :  { %v4553_v58 = vld [vmem:[#allocation2 + $0x124] ss:$16 sps:$4 sm:$0xff]   ;;  %v4558_v61 = vld [vmem:[#allocation2 + $0x320] ss:$16 sps:$4 sm:$0xff]  }
  0x81   :  { %2547 = vmatpush1.bf16.msra.mxu0 %v4515_v30  ;;  %v4555_v59 = vld [vmem:[#allocation2 + $0x324] ss:$16 sps:$4 sm:$0xff]   ;;  %v4563_v0 = vld [vmem:[#allocation2 + $0x100] ss:$16 sps:$4 sm:$0xff]  }
  0x82   :  { %2590 = vmatpush1.bf16.msra.mxu1 %v4516_v31  ;;  %2548 = vmatprep.subr.bf16.mxu0 %v4517_v32  ;;  %v4559_v62 = vld [vmem:[#allocation2 + $0x104] ss:$16 sps:$4 sm:$0xff]   ;;  %v4564_v1 = vld [vmem:[#allocation2 + $0x300] ss:$16 sps:$4 sm:$0xff]  }
  0x83   :  { %2591 = vmatprep.subr.bf16.mxu1 %v4519_v33  ;;  %v4561_v63 = vld [vmem:[#allocation2 + $0x304] ss:$16 sps:$4 sm:$0xff]   ;;  %v4565_v4 = vld [vmem:[%s5629_s0] ss:$48 sps:$4 sm:$0xff]  }
  0x84   :  { %v4573_v2 = vld [vmem:[#allocation2 + $0x4e4] ss:$16 sps:$4 sm:$0xff]   ;;  %v4571_v6 = vld [vmem:[#allocation2 + $0x4e0] ss:$16 sps:$4 sm:$0xff]  }
  0x85   :  { %2549 = vmatpush2.bf16.msra.mxu0 %v4521_v34  ;;  %v4576_v3 = vld [vmem:[#allocation2 + $0x6e4] ss:$16 sps:$4 sm:$0xff]   ;;  %v4574_v7 = vld [vmem:[#allocation2 + $0x6e0] ss:$16 sps:$4 sm:$0xff]  }
  0x86   :  { %2592 = vmatpush2.bf16.msra.mxu1 %v4522_v35  ;;  %2550 = vmatprep.subr.bf16.mxu0 %v4523_v36  ;;  %v4579_v8 = vld [vmem:[#allocation2 + $0x4c4] ss:$16 sps:$4 sm:$0xff]   ;;  %v4577_v10 = vld [vmem:[#allocation2 + $0x4c0] ss:$16 sps:$4 sm:$0xff]   ;;  %v4672_v35 = vld [vmem:[%s5629_s0 + $0x1c] ss:$48 sps:$4 sm:$0xff]  }
  0x87   :  { %2593 = vmatprep.subr.bf16.mxu1 %v4525_v37  ;;  %v4582_v9 = vld [vmem:[#allocation2 + $0x6c4] ss:$16 sps:$4 sm:$0xff]   ;;  %v4580_v11 = vld [vmem:[#allocation2 + $0x6c0] ss:$16 sps:$4 sm:$0xff]  }
  0x88   :  { %v4585_v12 = vld [vmem:[#allocation2 + $0x4a4] ss:$16 sps:$4 sm:$0xff]   ;;  %v4583_v14 = vld [vmem:[#allocation2 + $0x4a0] ss:$16 sps:$4 sm:$0xff]  }
  0x89   :  { %2551 = vmatpush2.bf16.msra.mxu0 %v4527_v38  ;;  %v4588_v13 = vld [vmem:[#allocation2 + $0x6a4] ss:$16 sps:$4 sm:$0xff]   ;;  %v4586_v15 = vld [vmem:[#allocation2 + $0x6a0] ss:$16 sps:$4 sm:$0xff]  }
  0x8a   :  { %2594 = vmatpush2.bf16.msra.mxu1 %v4528_v39  ;;  %2552 = vmatprep.subr.bf16.mxu0 %v4529_v40  ;;  %v4591_v16 = vld [vmem:[#allocation2 + $0x484] ss:$16 sps:$4 sm:$0xff]   ;;  %v4589_v18 = vld [vmem:[#allocation2 + $0x480] ss:$16 sps:$4 sm:$0xff]  }
  0x8b   :  { %2595 = vmatprep.subr.bf16.mxu1 %v4531_v41  ;;  %v4594_v17 = vld [vmem:[#allocation2 + $0x684] ss:$16 sps:$4 sm:$0xff]   ;;  %v4592_v19 = vld [vmem:[#allocation2 + $0x680] ss:$16 sps:$4 sm:$0xff]  }
  0x8c   :  { %v4597_v20 = vld [vmem:[#allocation2 + $0x464] ss:$16 sps:$4 sm:$0xff]   ;;  %v4595_v22 = vld [vmem:[#allocation2 + $0x460] ss:$16 sps:$4 sm:$0xff]  }
  0x8d   :  { %2553 = vmatpush2.bf16.msra.mxu0 %v4533_v42  ;;  %v4600_v21 = vld [vmem:[#allocation2 + $0x664] ss:$16 sps:$4 sm:$0xff]   ;;  %v4598_v23 = vld [vmem:[#allocation2 + $0x660] ss:$16 sps:$4 sm:$0xff]  }
  0x8e   :  { %2596 = vmatpush2.bf16.msra.mxu1 %v4534_v43  ;;  %2554 = vmatprep.subr.bf16.mxu0 %v4535_v44  ;;  %v4603_v24 = vld [vmem:[#allocation2 + $0x444] ss:$16 sps:$4 sm:$0xff]   ;;  %v4601_v26 = vld [vmem:[#allocation2 + $0x440] ss:$16 sps:$4 sm:$0xff]  }
  0x8f   :  { %2597 = vmatprep.subr.bf16.mxu1 %v4537_v45  ;;  %v4606_v25 = vld [vmem:[#allocation2 + $0x644] ss:$16 sps:$4 sm:$0xff]   ;;  %v4604_v27 = vld [vmem:[#allocation2 + $0x640] ss:$16 sps:$4 sm:$0xff]  }
  0x90   :  { %v4609_v28 = vld [vmem:[#allocation2 + $0x424] ss:$16 sps:$4 sm:$0xff]   ;;  %v4607_v30 = vld [vmem:[#allocation2 + $0x420] ss:$16 sps:$4 sm:$0xff]  }
  0x91   :  { %2555 = vmatpush2.bf16.msra.mxu0 %v4539_v46  ;;  %v4612_v29 = vld [vmem:[#allocation2 + $0x624] ss:$16 sps:$4 sm:$0xff]   ;;  %v4610_v31 = vld [vmem:[#allocation2 + $0x620] ss:$16 sps:$4 sm:$0xff]  }
  0x92   :  { %2598 = vmatpush2.bf16.msra.mxu1 %v4540_v47  ;;  %2556 = vmatprep.subr.bf16.mxu0 %v4541_v48  ;;  %v4615_v32 = vld [vmem:[#allocation2 + $0x404] ss:$16 sps:$4 sm:$0xff]   ;;  %v4613_v36 = vld [vmem:[#allocation2 + $0x400] ss:$16 sps:$4 sm:$0xff]  }
  0x93   :  { %2599 = vmatprep.subr.bf16.mxu1 %v4543_v50  ;;  %v4618_v33 = vld [vmem:[#allocation2 + $0x604] ss:$16 sps:$4 sm:$0xff]   ;;  %v4616_v37 = vld [vmem:[#allocation2 + $0x600] ss:$16 sps:$4 sm:$0xff]  }
  0x94   :  { %v4669_v34 = vld [vmem:[%s5629_s0 + $0x14] ss:$48 sps:$4 sm:$0xff]   ;;  %v4619_v40 = vld [vmem:[#allocation2 + $0x5e0] ss:$16 sps:$4 sm:$0xff]  }
  0x95   :  { %2557 = vmatpush2.bf16.msra.mxu0 %v4545_v52  ;;  %v4621_v38 = vld [vmem:[#allocation2 + $0x5e4] ss:$16 sps:$4 sm:$0xff]   ;;  %v4622_v41 = vld [vmem:[#allocation2 + $0x7e0] ss:$16 sps:$4 sm:$0xff]  }
  0x96   :  { %2600 = vmatpush2.bf16.msra.mxu1 %v4546_v53  ;;  %2558 = vmatprep.subr.bf16.mxu0 %v4547_v54  ;;  %v4624_v39 = vld [vmem:[#allocation2 + $0x7e4] ss:$16 sps:$4 sm:$0xff]   ;;  %v4625_v44 = vld [vmem:[#allocation2 + $0x5c0] ss:$16 sps:$4 sm:$0xff]  }
  0x97   :  { %2601 = vmatprep.subr.bf16.mxu1 %v4549_v55  ;;  %v4627_v42 = vld [vmem:[#allocation2 + $0x5c4] ss:$16 sps:$4 sm:$0xff]   ;;  %v4628_v45 = vld [vmem:[#allocation2 + $0x7c0] ss:$16 sps:$4 sm:$0xff]  }
  0x98   :  { %v4630_v43 = vld [vmem:[#allocation2 + $0x7c4] ss:$16 sps:$4 sm:$0xff]   ;;  %v4631_v48 = vld [vmem:[#allocation2 + $0x5a0] ss:$16 sps:$4 sm:$0xff]  }
  0x99   :  { %2559 = vmatpush2.bf16.msra.mxu0 %v4551_v56  ;;  %v4633_v46 = vld [vmem:[#allocation2 + $0x5a4] ss:$16 sps:$4 sm:$0xff]   ;;  %v4634_v49 = vld [vmem:[#allocation2 + $0x7a0] ss:$16 sps:$4 sm:$0xff]  }
  0x9a   :  { %2602 = vmatpush2.bf16.msra.mxu1 %v4552_v57  ;;  %2560 = vmatprep.subr.bf16.mxu0 %v4553_v58  ;;  %v4636_v47 = vld [vmem:[#allocation2 + $0x7a4] ss:$16 sps:$4 sm:$0xff]   ;;  %v4637_v52 = vld [vmem:[#allocation2 + $0x580] ss:$16 sps:$4 sm:$0xff]  }
  0x9b   :  { %2603 = vmatprep.subr.bf16.mxu1 %v4555_v59  ;;  %v4639_v50 = vld [vmem:[#allocation2 + $0x584] ss:$16 sps:$4 sm:$0xff]   ;;  %v4640_v53 = vld [vmem:[#allocation2 + $0x780] ss:$16 sps:$4 sm:$0xff]  }
  0x9c   :  { %v4642_v51 = vld [vmem:[#allocation2 + $0x784] ss:$16 sps:$4 sm:$0xff]   ;;  %v4643_v56 = vld [vmem:[#allocation2 + $0x560] ss:$16 sps:$4 sm:$0xff]  }
  0x9d   :  { %2561 = vmatpush2.bf16.msra.mxu0 %v4557_v60  ;;  %v4645_v54 = vld [vmem:[#allocation2 + $0x564] ss:$16 sps:$4 sm:$0xff]   ;;  %v4646_v57 = vld [vmem:[#allocation2 + $0x760] ss:$16 sps:$4 sm:$0xff]  }
  0x9e   :  { %2604 = vmatpush2.bf16.msra.mxu1 %v4558_v61  ;;  %2562 = vmatprep.subr.bf16.mxu0 %v4559_v62  ;;  %v4648_v55 = vld [vmem:[#allocation2 + $0x764] ss:$16 sps:$4 sm:$0xff]   ;;  %v4649_v60 = vld [vmem:[#allocation2 + $0x540] ss:$16 sps:$4 sm:$0xff]  }
  0x9f   :  { %2605 = vmatprep.subr.bf16.mxu1 %v4561_v63  ;;  %v4651_v58 = vld [vmem:[#allocation2 + $0x544] ss:$16 sps:$4 sm:$0xff]   ;;  %v4652_v61 = vld [vmem:[#allocation2 + $0x740] ss:$16 sps:$4 sm:$0xff]  }
  0xa0   :  { %v4654_v59 = vld [vmem:[#allocation2 + $0x744] ss:$16 sps:$4 sm:$0xff]  }
  0xa1   :  { %2563 = vmatpush2.bf16.msra.mxu0 %v4563_v0  ;;  %v4657_v62 = vld [vmem:[#allocation2 + $0x524] ss:$16 sps:$4 sm:$0xff]   ;;  %v4655_v0 = vld [vmem:[#allocation2 + $0x520] ss:$16 sps:$4 sm:$0xff]  }
  0xa2   :  { %2606 = vmatpush2.bf16.msra.mxu1 %v4564_v1  ;;  %2618 = vmatprep.subr.bf16.mxu0 %v4573_v2  ;;  %v4660_v63 = vld [vmem:[#allocation2 + $0x724] ss:$16 sps:$4 sm:$0xff]   ;;  %v4658_v1 = vld [vmem:[#allocation2 + $0x720] ss:$16 sps:$4 sm:$0xff]  }
  0xa3   :  { %2661 = vmatprep.subr.bf16.mxu1 %v4576_v3  ;;  %v4663_v2 = vld [vmem:[#allocation2 + $0x504] ss:$16 sps:$4 sm:$0xff]  }
  0xa4   :  { %2565 = vmatmul.mubr.bf16.vlgmr.msra.gmra.mxu0 %v4565_v4  ;;  %v4666_v3 = vld [vmem:[#allocation2 + $0x704] ss:$16 sps:$4 sm:$0xff]   ;;  %v4661_v4 = vld [vmem:[#allocation2 + $0x500] ss:$16 sps:$4 sm:$0xff]  }
  0xa5   :  { %2608 = vmatmul.mubr.bf16.vlgmr.msra.gmra.mxu1 %v4568_v5  ;;  %2619 = vmatpush1.bf16.msra.mxu0 %v4571_v6  ;;  %v4664_v5 = vld [vmem:[#allocation2 + $0x700] ss:$16 sps:$4 sm:$0xff]   ;;  %v4675_v6 = vld [vmem:[#allocation2 + $0x8e4] ss:$16 sps:$4 sm:$0xff]  }
  0xa6   :  { %2662 = vmatpush1.bf16.msra.mxu1 %v4574_v7  ;;  %2620 = vmatprep.subr.bf16.mxu0 %v4579_v8  ;;  %v4678_v7 = vld [vmem:[#allocation2 + $0xae4] ss:$16 sps:$4 sm:$0xff]   ;;  %v4667_v8 = vld [vmem:[%s5629_s0 + $0x10] ss:$48 sps:$4 sm:$0xff]  }
  0xa7   :  { %2663 = vmatprep.subr.bf16.mxu1 %v4582_v9  ;;  %2650 = vmatprep.mubr.bf16.mxu0 %v4669_v34  ;;  %v4670_v9 = vld [vmem:[%s5629_s0 + $0x18] ss:$48 sps:$4 sm:$0xff]   ;;  %v4711_v34 = vld [vmem:[#allocation2 + $0x824] ss:$16 sps:$4 sm:$0xff]  }
  0xa8   :  { %2693 = vmatprep.mubr.bf16.mxu1 %v4672_v35  ;;  %v4714_v35 = vld [vmem:[#allocation2 + $0xa24] ss:$16 sps:$4 sm:$0xff]  }
  0xa9   :  { %2621 = vmatpush1.bf16.msra.mxu0 %v4577_v10  ;;  %v4673_v10 = vld [vmem:[#allocation2 + $0x8e0] ss:$16 sps:$4 sm:$0xff]  }
  0xaa   :  { %2664 = vmatpush1.bf16.msra.mxu1 %v4580_v11  ;;  %2622 = vmatprep.subr.bf16.mxu0 %v4585_v12  ;;  %v4676_v11 = vld [vmem:[#allocation2 + $0xae0] ss:$16 sps:$4 sm:$0xff]   ;;  %v4681_v12 = vld [vmem:[#allocation2 + $0x8c4] ss:$16 sps:$4 sm:$0xff]  }
  0xab   :  { %2665 = vmatprep.subr.bf16.mxu1 %v4588_v13  ;;  %v4684_v13 = vld [vmem:[#allocation2 + $0xac4] ss:$16 sps:$4 sm:$0xff]  }
  0xad   :  { %2623 = vmatpush1.bf16.msra.mxu0 %v4583_v14  ;;  %v4679_v14 = vld [vmem:[#allocation2 + $0x8c0] ss:$16 sps:$4 sm:$0xff]  }
  0xae   :  { %2666 = vmatpush1.bf16.msra.mxu1 %v4586_v15  ;;  %2624 = vmatprep.subr.bf16.mxu0 %v4591_v16  ;;  %v4682_v15 = vld [vmem:[#allocation2 + $0xac0] ss:$16 sps:$4 sm:$0xff]   ;;  %v4687_v16 = vld [vmem:[#allocation2 + $0x8a4] ss:$16 sps:$4 sm:$0xff]  }
  0xaf   :  { %2667 = vmatprep.subr.bf16.mxu1 %v4594_v17  ;;  %v4690_v17 = vld [vmem:[#allocation2 + $0xaa4] ss:$16 sps:$4 sm:$0xff]  }
  0xb1   :  { %2625 = vmatpush1.bf16.msra.mxu0 %v4589_v18  ;;  %v4685_v18 = vld [vmem:[#allocation2 + $0x8a0] ss:$16 sps:$4 sm:$0xff]  }
  0xb2   :  { %2668 = vmatpush1.bf16.msra.mxu1 %v4592_v19  ;;  %2626 = vmatprep.subr.bf16.mxu0 %v4597_v20  ;;  %v4771_v19 = vld [vmem:[%s5629_s0 + $0x24] ss:$48 sps:$4 sm:$0xff]   ;;  %v4688_v20 = vld [vmem:[#allocation2 + $0xaa0] ss:$16 sps:$4 sm:$0xff]  }
  0xb3   :  { %2669 = vmatprep.subr.bf16.mxu1 %v4600_v21  ;;  %v4774_v21 = vld [vmem:[%s5629_s0 + $0x2c] ss:$48 sps:$4 sm:$0xff]  }
  0xb5   :  { %2627 = vmatpush1.bf16.msra.mxu0 %v4595_v22  ;;  %v4693_v22 = vld [vmem:[#allocation2 + $0x884] ss:$16 sps:$4 sm:$0xff]  }
  0xb6   :  { %2670 = vmatpush1.bf16.msra.mxu1 %v4598_v23  ;;  %2628 = vmatprep.subr.bf16.mxu0 %v4603_v24  ;;  %v4696_v23 = vld [vmem:[#allocation2 + $0xa84] ss:$16 sps:$4 sm:$0xff]   ;;  %v4691_v24 = vld [vmem:[#allocation2 + $0x880] ss:$16 sps:$4 sm:$0xff]  }
  0xb7   :  { %2671 = vmatprep.subr.bf16.mxu1 %v4606_v25  ;;  %v4694_v25 = vld [vmem:[#allocation2 + $0xa80] ss:$16 sps:$4 sm:$0xff]  }
  0xb9   :  { %2629 = vmatpush1.bf16.msra.mxu0 %v4601_v26  ;;  %v4699_v26 = vld [vmem:[#allocation2 + $0x864] ss:$16 sps:$4 sm:$0xff]  }
  0xba   :  { %2672 = vmatpush1.bf16.msra.mxu1 %v4604_v27  ;;  %2630 = vmatprep.subr.bf16.mxu0 %v4609_v28  ;;  %v4702_v27 = vld [vmem:[#allocation2 + $0xa64] ss:$16 sps:$4 sm:$0xff]   ;;  %v4697_v28 = vld [vmem:[#allocation2 + $0x860] ss:$16 sps:$4 sm:$0xff]  }
  0xbb   :  { %2673 = vmatprep.subr.bf16.mxu1 %v4612_v29  ;;  %v4700_v29 = vld [vmem:[#allocation2 + $0xa60] ss:$16 sps:$4 sm:$0xff]  }
  0xbd   :  { %2631 = vmatpush1.bf16.msra.mxu0 %v4607_v30  ;;  %v4705_v30 = vld [vmem:[#allocation2 + $0x844] ss:$16 sps:$4 sm:$0xff]  }
  0xbe   :  { %2674 = vmatpush1.bf16.msra.mxu1 %v4610_v31  ;;  %2632 = vmatprep.subr.bf16.mxu0 %v4615_v32  ;;  %v4708_v31 = vld [vmem:[#allocation2 + $0xa44] ss:$16 sps:$4 sm:$0xff]   ;;  %v4703_v32 = vld [vmem:[#allocation2 + $0x840] ss:$16 sps:$4 sm:$0xff]  }
  0xbf   :  { %2675 = vmatprep.subr.bf16.mxu1 %v4618_v33  ;;  %v4706_v33 = vld [vmem:[#allocation2 + $0xa40] ss:$16 sps:$4 sm:$0xff]  }
  0xc1   :  { %2633 = vmatpush1.bf16.msra.mxu0 %v4613_v36  ;;  %v4709_v36 = vld [vmem:[#allocation2 + $0x820] ss:$16 sps:$4 sm:$0xff]  }
  0xc2   :  { %2676 = vmatpush1.bf16.msra.mxu1 %v4616_v37  ;;  %2634 = vmatprep.subr.bf16.mxu0 %v4621_v38  ;;  %v4712_v37 = vld [vmem:[#allocation2 + $0xa20] ss:$16 sps:$4 sm:$0xff]   ;;  %v4717_v38 = vld [vmem:[#allocation2 + $0x804] ss:$16 sps:$4 sm:$0xff]  }
  0xc3   :  { %2677 = vmatprep.subr.bf16.mxu1 %v4624_v39  ;;  %v4720_v39 = vld [vmem:[#allocation2 + $0xa04] ss:$16 sps:$4 sm:$0xff]  }
  0xc5   :  { %2635 = vmatpush2.bf16.msra.mxu0 %v4619_v40  ;;  %v4715_v40 = vld [vmem:[#allocation2 + $0x800] ss:$16 sps:$4 sm:$0xff]  }
  0xc6   :  { %2678 = vmatpush2.bf16.msra.mxu1 %v4622_v41  ;;  %2636 = vmatprep.subr.bf16.mxu0 %v4627_v42  ;;  %v4718_v41 = vld [vmem:[#allocation2 + $0xa00] ss:$16 sps:$4 sm:$0xff]   ;;  %v4723_v42 = vld [vmem:[#allocation2 + $0x9e4] ss:$16 sps:$4 sm:$0xff]  }
  0xc7   :  { %2679 = vmatprep.subr.bf16.mxu1 %v4630_v43  ;;  %v4726_v43 = vld [vmem:[#allocation2 + $0xbe4] ss:$16 sps:$4 sm:$0xff]  }
  0xc9   :  { %2637 = vmatpush2.bf16.msra.mxu0 %v4625_v44  ;;  %v4721_v44 = vld [vmem:[#allocation2 + $0x9e0] ss:$16 sps:$4 sm:$0xff]  }
  0xca   :  { %2680 = vmatpush2.bf16.msra.mxu1 %v4628_v45  ;;  %2638 = vmatprep.subr.bf16.mxu0 %v4633_v46  ;;  %v4724_v45 = vld [vmem:[#allocation2 + $0xbe0] ss:$16 sps:$4 sm:$0xff]   ;;  %v4729_v46 = vld [vmem:[#allocation2 + $0x9c4] ss:$16 sps:$4 sm:$0xff]  }
  0xcb   :  { %2681 = vmatprep.subr.bf16.mxu1 %v4636_v47  ;;  %v4732_v47 = vld [vmem:[#allocation2 + $0xbc4] ss:$16 sps:$4 sm:$0xff]  }
  0xcd   :  { %2639 = vmatpush2.bf16.msra.mxu0 %v4631_v48  ;;  %v4727_v48 = vld [vmem:[#allocation2 + $0x9c0] ss:$16 sps:$4 sm:$0xff]  }
  0xce   :  { %2682 = vmatpush2.bf16.msra.mxu1 %v4634_v49  ;;  %2640 = vmatprep.subr.bf16.mxu0 %v4639_v50  ;;  %v4730_v49 = vld [vmem:[#allocation2 + $0xbc0] ss:$16 sps:$4 sm:$0xff]   ;;  %v4735_v50 = vld [vmem:[#allocation2 + $0x9a4] ss:$16 sps:$4 sm:$0xff]  }
  0xcf   :  { %2683 = vmatprep.subr.bf16.mxu1 %v4642_v51  ;;  %v4738_v51 = vld [vmem:[#allocation2 + $0xba4] ss:$16 sps:$4 sm:$0xff]  }
  0xd1   :  { %2641 = vmatpush2.bf16.msra.mxu0 %v4637_v52  ;;  %v4733_v52 = vld [vmem:[#allocation2 + $0x9a0] ss:$16 sps:$4 sm:$0xff]  }
  0xd2   :  { %2684 = vmatpush2.bf16.msra.mxu1 %v4640_v53  ;;  %2642 = vmatprep.subr.bf16.mxu0 %v4645_v54  ;;  %v4736_v53 = vld [vmem:[#allocation2 + $0xba0] ss:$16 sps:$4 sm:$0xff]   ;;  %v4741_v54 = vld [vmem:[#allocation2 + $0x984] ss:$16 sps:$4 sm:$0xff]  }
  0xd3   :  { %2685 = vmatprep.subr.bf16.mxu1 %v4648_v55  ;;  %v4744_v55 = vld [vmem:[#allocation2 + $0xb84] ss:$16 sps:$4 sm:$0xff]  }
  0xd5   :  { %2643 = vmatpush2.bf16.msra.mxu0 %v4643_v56  ;;  %v4739_v56 = vld [vmem:[#allocation2 + $0x980] ss:$16 sps:$4 sm:$0xff]  }
  0xd6   :  { %2686 = vmatpush2.bf16.msra.mxu1 %v4646_v57  ;;  %2644 = vmatprep.subr.bf16.mxu0 %v4651_v58  ;;  %v4742_v57 = vld [vmem:[#allocation2 + $0xb80] ss:$16 sps:$4 sm:$0xff]   ;;  %v4747_v58 = vld [vmem:[#allocation2 + $0x964] ss:$16 sps:$4 sm:$0xff]  }
  0xd7   :  { %2687 = vmatprep.subr.bf16.mxu1 %v4654_v59  ;;  %v4750_v59 = vld [vmem:[#allocation2 + $0xb64] ss:$16 sps:$4 sm:$0xff]  }
  0xd9   :  { %2645 = vmatpush2.bf16.msra.mxu0 %v4649_v60  ;;  %v4745_v60 = vld [vmem:[#allocation2 + $0x960] ss:$16 sps:$4 sm:$0xff]  }
  0xda   :  { %2688 = vmatpush2.bf16.msra.mxu1 %v4652_v61  ;;  %2646 = vmatprep.subr.bf16.mxu0 %v4657_v62  ;;  %v4748_v61 = vld [vmem:[#allocation2 + $0xb60] ss:$16 sps:$4 sm:$0xff]   ;;  %v4753_v62 = vld [vmem:[#allocation2 + $0x944] ss:$16 sps:$4 sm:$0xff]  }
  0xdb   :  { %2689 = vmatprep.subr.bf16.mxu1 %v4660_v63  ;;  %v4756_v63 = vld [vmem:[#allocation2 + $0xb44] ss:$16 sps:$4 sm:$0xff]  }
  0xdd   :  { %2647 = vmatpush2.bf16.msra.mxu0 %v4655_v0  ;;  %v4751_v0 = vld [vmem:[#allocation2 + $0x940] ss:$16 sps:$4 sm:$0xff]  }
  0xde   :  { %2690 = vmatpush2.bf16.msra.mxu1 %v4658_v1  ;;  %2648 = vmatprep.subr.bf16.mxu0 %v4663_v2  ;;  %v4754_v1 = vld [vmem:[#allocation2 + $0xb40] ss:$16 sps:$4 sm:$0xff]   ;;  %v4759_v2 = vld [vmem:[#allocation2 + $0x924] ss:$16 sps:$4 sm:$0xff]  }
  0xdf   :  { %2691 = vmatprep.subr.bf16.mxu1 %v4666_v3  ;;  %v4762_v3 = vld [vmem:[#allocation2 + $0xb24] ss:$16 sps:$4 sm:$0xff]  }
  0xe1   :  { %2649 = vmatpush2.bf16.msra.mxu0 %v4661_v4  ;;  %v4757_v4 = vld [vmem:[#allocation2 + $0x920] ss:$16 sps:$4 sm:$0xff]  }
  0xe2   :  { %2692 = vmatpush2.bf16.msra.mxu1 %v4664_v5  ;;  %2704 = vmatprep.subr.bf16.mxu0 %v4675_v6  ;;  %v4760_v5 = vld [vmem:[#allocation2 + $0xb20] ss:$16 sps:$4 sm:$0xff]   ;;  %v4765_v6 = vld [vmem:[#allocation2 + $0x904] ss:$16 sps:$4 sm:$0xff]  }
  0xe3   :  { %2747 = vmatprep.subr.bf16.mxu1 %v4678_v7  ;;  %v4768_v7 = vld [vmem:[#allocation2 + $0xb04] ss:$16 sps:$4 sm:$0xff]  }
  0xe4   :  { %2651 = vmatmul.mubr.bf16.vlgmr.msra.gmra.mxu0 %v4667_v8  ;;  %v4763_v8 = vld [vmem:[#allocation2 + $0x900] ss:$16 sps:$4 sm:$0xff]  }
  0xe5   :  { %2694 = vmatmul.mubr.bf16.vlgmr.msra.gmra.mxu1 %v4670_v9  ;;  %2705 = vmatpush1.bf16.msra.mxu0 %v4673_v10  ;;  %v4766_v9 = vld [vmem:[#allocation2 + $0xb00] ss:$16 sps:$4 sm:$0xff]   ;;  %v4777_v10 = vld [vmem:[#allocation2 + $0xec] ss:$16 sps:$4 sm:$0xff]  }
  0xe6   :  { %2748 = vmatpush1.bf16.msra.mxu1 %v4676_v11  ;;  %2706 = vmatprep.subr.bf16.mxu0 %v4681_v12  ;;  %v4780_v11 = vld [vmem:[#allocation2 + $0x2ec] ss:$16 sps:$4 sm:$0xff]   ;;  %v4769_v12 = vld [vmem:[%s5629_s0 + $0x20] ss:$48 sps:$4 sm:$0xff]  }
  0xe7   :  { %2749 = vmatprep.subr.bf16.mxu1 %v4684_v13  ;;  %2736 = vmatprep.mubr.bf16.mxu0 %v4771_v19  ;;  %v4772_v13 = vld [vmem:[%s5629_s0 + $0x28] ss:$48 sps:$4 sm:$0xff]  }
  0xe8   :  { %2779 = vmatprep.mubr.bf16.mxu1 %v4774_v21  ;;  %v4784_v19 = vld [vmem:[#allocation2 + $0x2c8] ss:$16 sps:$4 sm:$0xff]   ;;  %v4792_v21 = vld [vmem:[#allocation2 + $0x2ac] ss:$16 sps:$4 sm:$0xff]  }
  0xe9   :  { %2707 = vmatpush1.bf16.msra.mxu0 %v4679_v14  ;;  %v4775_v14 = vld [vmem:[#allocation2 + $0xe8] ss:$16 sps:$4 sm:$0xff]  }
  0xea   :  { %2750 = vmatpush1.bf16.msra.mxu1 %v4682_v15  ;;  %2708 = vmatprep.subr.bf16.mxu0 %v4687_v16  ;;  %v4778_v15 = vld [vmem:[#allocation2 + $0x2e8] ss:$16 sps:$4 sm:$0xff]   ;;  %v4783_v16 = vld [vmem:[#allocation2 + $0xcc] ss:$16 sps:$4 sm:$0xff]  }
  0xeb   :  { %2751 = vmatprep.subr.bf16.mxu1 %v4690_v17  ;;  %v4786_v17 = vld [vmem:[#allocation2 + $0x2cc] ss:$16 sps:$4 sm:$0xff]  }
  0xed   :  { %2709 = vmatpush1.bf16.msra.mxu0 %v4685_v18  ;;  %v4781_v18 = vld [vmem:[#allocation2 + $0xc8] ss:$16 sps:$4 sm:$0xff]  }
  0xee   :  { %2752 = vmatpush1.bf16.msra.mxu1 %v4688_v20  ;;  %2710 = vmatprep.subr.bf16.mxu0 %v4693_v22  ;;  %v4789_v20 = vld [vmem:[#allocation2 + $0xac] ss:$16 sps:$4 sm:$0xff]   ;;  %v5215_v22 = vld [vmem:[%s5629_s0 + $0x4] ss:$48 sps:$4 sm:$0xff]  }
  0xef   :  { %2753 = vmatprep.subr.bf16.mxu1 %v4696_v23  ;;  %v5216_v23 = vld [vmem:[%s5629_s0 + $0xc] ss:$48 sps:$4 sm:$0xff]  }
  0xf1   :  { %2711 = vmatpush1.bf16.msra.mxu0 %v4691_v24  ;;  %v4787_v24 = vld [vmem:[#allocation2 + $0xa8] ss:$16 sps:$4 sm:$0xff]  }
  0xf2   :  { %2754 = vmatpush1.bf16.msra.mxu1 %v4694_v25  ;;  %2712 = vmatprep.subr.bf16.mxu0 %v4699_v26  ;;  %v4790_v25 = vld [vmem:[#allocation2 + $0x2a8] ss:$16 sps:$4 sm:$0xff]   ;;  %v4795_v26 = vld [vmem:[#allocation2 + $0x8c] ss:$16 sps:$4 sm:$0xff]  }
  0xf3   :  { %2755 = vmatprep.subr.bf16.mxu1 %v4702_v27  ;;  %v4798_v27 = vld [vmem:[#allocation2 + $0x28c] ss:$16 sps:$4 sm:$0xff]  }
  0xf5   :  { %2713 = vmatpush1.bf16.msra.mxu0 %v4697_v28  ;;  %v4793_v28 = vld [vmem:[#allocation2 + $0x88] ss:$16 sps:$4 sm:$0xff]  }
  0xf6   :  { %2756 = vmatpush1.bf16.msra.mxu1 %v4700_v29  ;;  %2714 = vmatprep.subr.bf16.mxu0 %v4705_v30  ;;  %v4796_v29 = vld [vmem:[#allocation2 + $0x288] ss:$16 sps:$4 sm:$0xff]   ;;  %v4801_v30 = vld [vmem:[#allocation2 + $0x6c] ss:$16 sps:$4 sm:$0xff]  }
  0xf7   :  { %2757 = vmatprep.subr.bf16.mxu1 %v4708_v31  ;;  %v4804_v31 = vld [vmem:[#allocation2 + $0x26c] ss:$16 sps:$4 sm:$0xff]  }
  0xf9   :  { %2715 = vmatpush1.bf16.msra.mxu0 %v4703_v32  ;;  %v4799_v32 = vld [vmem:[#allocation2 + $0x68] ss:$16 sps:$4 sm:$0xff]  }
  0xfa   :  { %2758 = vmatpush1.bf16.msra.mxu1 %v4706_v33  ;;  %2716 = vmatprep.subr.bf16.mxu0 %v4711_v34  ;;  %v4802_v33 = vld [vmem:[#allocation2 + $0x268] ss:$16 sps:$4 sm:$0xff]   ;;  %v4807_v34 = vld [vmem:[#allocation2 + $0x4c] ss:$16 sps:$4 sm:$0xff]  }
  0xfb   :  { %2759 = vmatprep.subr.bf16.mxu1 %v4714_v35  ;;  %v4810_v35 = vld [vmem:[#allocation2 + $0x24c] ss:$16 sps:$4 sm:$0xff]  }
  0xfd   :  { %2717 = vmatpush1.bf16.msra.mxu0 %v4709_v36  ;;  %v4805_v36 = vld [vmem:[#allocation2 + $0x48] ss:$16 sps:$4 sm:$0xff]  }
  0xfe   :  { %2760 = vmatpush1.bf16.msra.mxu1 %v4712_v37  ;;  %2718 = vmatprep.subr.bf16.mxu0 %v4717_v38  ;;  %v4808_v37 = vld [vmem:[#allocation2 + $0x248] ss:$16 sps:$4 sm:$0xff]   ;;  %v4813_v38 = vld [vmem:[#allocation2 + $0x2c] ss:$16 sps:$4 sm:$0xff]  }
  0xff   :  { %2761 = vmatprep.subr.bf16.mxu1 %v4720_v39  ;;  %v4816_v39 = vld [vmem:[#allocation2 + $0x22c] ss:$16 sps:$4 sm:$0xff]  }
 0x101   :  { %2719 = vmatpush1.bf16.msra.mxu0 %v4715_v40  ;;  %v4811_v40 = vld [vmem:[#allocation2 + $0x28] ss:$16 sps:$4 sm:$0xff]  }
 0x102   :  { %2762 = vmatpush1.bf16.msra.mxu1 %v4718_v41  ;;  %2720 = vmatprep.subr.bf16.mxu0 %v4723_v42  ;;  %v4814_v41 = vld [vmem:[#allocation2 + $0x228] ss:$16 sps:$4 sm:$0xff]   ;;  %v4819_v42 = vld [vmem:[#allocation2 + $0xc] ss:$16 sps:$4 sm:$0xff]  }
 0x103   :  { %2763 = vmatprep.subr.bf16.mxu1 %v4726_v43  ;;  %v4822_v43 = vld [vmem:[#allocation2 + $0x20c] ss:$16 sps:$4 sm:$0xff]  }
 0x105   :  { %2721 = vmatpush2.bf16.msra.mxu0 %v4721_v44  ;;  %v4817_v44 = vld [vmem:[#allocation2 + $0x8] ss:$16 sps:$4 sm:$0xff]  }
 0x106   :  { %2764 = vmatpush2.bf16.msra.mxu1 %v4724_v45  ;;  %2722 = vmatprep.subr.bf16.mxu0 %v4729_v46  ;;  %v4820_v45 = vld [vmem:[#allocation2 + $0x208] ss:$16 sps:$4 sm:$0xff]   ;;  %v4825_v46 = vld [vmem:[#allocation2 + $0x1ec] ss:$16 sps:$4 sm:$0xff]  }
 0x107   :  { %2765 = vmatprep.subr.bf16.mxu1 %v4732_v47  ;;  %v4828_v47 = vld [vmem:[#allocation2 + $0x3ec] ss:$16 sps:$4 sm:$0xff]  }
 0x109   :  { %2723 = vmatpush2.bf16.msra.mxu0 %v4727_v48  ;;  %v4823_v48 = vld [vmem:[#allocation2 + $0x1e8] ss:$16 sps:$4 sm:$0xff]  }
 0x10a   :  { %2766 = vmatpush2.bf16.msra.mxu1 %v4730_v49  ;;  %2724 = vmatprep.subr.bf16.mxu0 %v4735_v50  ;;  %v4826_v49 = vld [vmem:[#allocation2 + $0x3e8] ss:$16 sps:$4 sm:$0xff]   ;;  %v4831_v50 = vld [vmem:[#allocation2 + $0x1cc] ss:$16 sps:$4 sm:$0xff]  }
 0x10b   :  { %2767 = vmatprep.subr.bf16.mxu1 %v4738_v51  ;;  %v4834_v51 = vld [vmem:[#allocation2 + $0x3cc] ss:$16 sps:$4 sm:$0xff]  }
 0x10d   :  { %2725 = vmatpush2.bf16.msra.mxu0 %v4733_v52  ;;  %v4829_v52 = vld [vmem:[#allocation2 + $0x1c8] ss:$16 sps:$4 sm:$0xff]  }
 0x10e   :  { %2768 = vmatpush2.bf16.msra.mxu1 %v4736_v53  ;;  %2726 = vmatprep.subr.bf16.mxu0 %v4741_v54  ;;  %v4832_v53 = vld [vmem:[#allocation2 + $0x3c8] ss:$16 sps:$4 sm:$0xff]   ;;  %v4837_v54 = vld [vmem:[#allocation2 + $0x1ac] ss:$16 sps:$4 sm:$0xff]  }
 0x10f   :  { %2769 = vmatprep.subr.bf16.mxu1 %v4744_v55  ;;  %v4840_v55 = vld [vmem:[#allocation2 + $0x3ac] ss:$16 sps:$4 sm:$0xff]  }
 0x111   :  { %2727 = vmatpush2.bf16.msra.mxu0 %v4739_v56  ;;  %v4835_v56 = vld [vmem:[#allocation2 + $0x1a8] ss:$16 sps:$4 sm:$0xff]  }
 0x112   :  { %2770 = vmatpush2.bf16.msra.mxu1 %v4742_v57  ;;  %2728 = vmatprep.subr.bf16.mxu0 %v4747_v58  ;;  %v4838_v57 = vld [vmem:[#allocation2 + $0x3a8] ss:$16 sps:$4 sm:$0xff]   ;;  %v4843_v58 = vld [vmem:[#allocation2 + $0x18c] ss:$16 sps:$4 sm:$0xff]  }
 0x113   :  { %2771 = vmatprep.subr.bf16.mxu1 %v4750_v59  ;;  %v4846_v59 = vld [vmem:[#allocation2 + $0x38c] ss:$16 sps:$4 sm:$0xff]  }
 0x115   :  { %2729 = vmatpush2.bf16.msra.mxu0 %v4745_v60  ;;  %v4841_v60 = vld [vmem:[#allocation2 + $0x188] ss:$16 sps:$4 sm:$0xff]  }
 0x116   :  { %2772 = vmatpush2.bf16.msra.mxu1 %v4748_v61  ;;  %2730 = vmatprep.subr.bf16.mxu0 %v4753_v62  ;;  %v4844_v61 = vld [vmem:[#allocation2 + $0x388] ss:$16 sps:$4 sm:$0xff]   ;;  %v4849_v62 = vld [vmem:[#allocation2 + $0x16c] ss:$16 sps:$4 sm:$0xff]  }
 0x117   :  { %2773 = vmatprep.subr.bf16.mxu1 %v4756_v63  ;;  %v4852_v63 = vld [vmem:[#allocation2 + $0x36c] ss:$16 sps:$4 sm:$0xff]  }
 0x119   :  { %2731 = vmatpush2.bf16.msra.mxu0 %v4751_v0  ;;  %v4847_v0 = vld [vmem:[#allocation2 + $0x168] ss:$16 sps:$4 sm:$0xff]  }
 0x11a   :  { %2774 = vmatpush2.bf16.msra.mxu1 %v4754_v1  ;;  %2732 = vmatprep.subr.bf16.mxu0 %v4759_v2  ;;  %v4850_v1 = vld [vmem:[#allocation2 + $0x368] ss:$16 sps:$4 sm:$0xff]   ;;  %v4855_v2 = vld [vmem:[#allocation2 + $0x14c] ss:$16 sps:$4 sm:$0xff]  }
 0x11b   :  { %2775 = vmatprep.subr.bf16.mxu1 %v4762_v3  ;;  %v4858_v3 = vld [vmem:[#allocation2 + $0x34c] ss:$16 sps:$4 sm:$0xff]  }
 0x11d   :  { %2733 = vmatpush2.bf16.msra.mxu0 %v4757_v4  ;;  %v4853_v4 = vld [vmem:[#allocation2 + $0x148] ss:$16 sps:$4 sm:$0xff]  }
 0x11e   :  { %2776 = vmatpush2.bf16.msra.mxu1 %v4760_v5  ;;  %2734 = vmatprep.subr.bf16.mxu0 %v4765_v6  ;;  %v4856_v5 = vld [vmem:[#allocation2 + $0x348] ss:$16 sps:$4 sm:$0xff]   ;;  %v4861_v6 = vld [vmem:[#allocation2 + $0x12c] ss:$16 sps:$4 sm:$0xff]  }
 0x11f   :  { %2777 = vmatprep.subr.bf16.mxu1 %v4768_v7  ;;  %v4864_v7 = vld [vmem:[#allocation2 + $0x32c] ss:$16 sps:$4 sm:$0xff]  }
 0x121   :  { %2735 = vmatpush2.bf16.msra.mxu0 %v4763_v8  ;;  %v4859_v8 = vld [vmem:[#allocation2 + $0x128] ss:$16 sps:$4 sm:$0xff]  }
 0x122   :  { %2778 = vmatpush2.bf16.msra.mxu1 %v4766_v9  ;;  %2790 = vmatprep.subr.bf16.mxu0 %v4777_v10  ;;  %v4862_v9 = vld [vmem:[#allocation2 + $0x328] ss:$16 sps:$4 sm:$0xff]   ;;  %v4867_v10 = vld [vmem:[#allocation2 + $0x10c] ss:$16 sps:$4 sm:$0xff]  }
 0x123   :  { %2833 = vmatprep.subr.bf16.mxu1 %v4780_v11  ;;  %v4870_v11 = vld [vmem:[#allocation2 + $0x30c] ss:$16 sps:$4 sm:$0xff]  }
 0x124   :  { %2737 = vmatmul.mubr.bf16.vlgmr.msra.gmra.mxu0 %v4769_v12  ;;  %v4865_v12 = vld [vmem:[#allocation2 + $0x108] ss:$16 sps:$4 sm:$0xff]  }
 0x125   :  { %2780 = vmatmul.mubr.bf16.vlgmr.msra.gmra.mxu1 %v4772_v13  ;;  %2791 = vmatpush1.bf16.msra.mxu0 %v4775_v14  ;;  %v4868_v13 = vld [vmem:[#allocation2 + $0x308] ss:$16 sps:$4 sm:$0xff]   ;;  %v4873_v14 = vld [vmem:[#allocation2 + $0x4ec] ss:$16 sps:$4 sm:$0xff]  }
 0x126   :  { %2834 = vmatpush1.bf16.msra.mxu1 %v4778_v15  ;;  %2792 = vmatprep.subr.bf16.mxu0 %v4783_v16  ;;  %v4876_v15 = vld [vmem:[#allocation2 + $0x6ec] ss:$16 sps:$4 sm:$0xff]   ;;  %v4871_v16 = vld [vmem:[#allocation2 + $0x4e8] ss:$16 sps:$4 sm:$0xff]  }
 0x127   :  { %2835 = vmatprep.subr.bf16.mxu1 %v4786_v17  ;;  %2822 = vmatprep.mubr.bf16.mxu0 %v5215_v22  ;;  %v4874_v17 = vld [vmem:[#allocation2 + $0x6e8] ss:$16 sps:$4 sm:$0xff]  }
 0x128   :  { %2865 = vmatprep.mubr.bf16.mxu1 %v5216_v23  ;;  %v4877_v22 = vld [vmem:[#allocation2 + $0x4c8] ss:$16 sps:$4 sm:$0xff]  }
 0x129   :  { %2793 = vmatpush1.bf16.msra.mxu0 %v4781_v18  ;;  %v4879_v18 = vld [vmem:[#allocation2 + $0x4cc] ss:$16 sps:$4 sm:$0xff]   ;;  %v4880_v23 = vld [vmem:[#allocation2 + $0x6c8] ss:$16 sps:$4 sm:$0xff]  }
 0x12a   :  { %2836 = vmatpush1.bf16.msra.mxu1 %v4784_v19  ;;  %2794 = vmatprep.subr.bf16.mxu0 %v4789_v20  ;;  %v4882_v19 = vld [vmem:[#allocation2 + $0x6cc] ss:$16 sps:$4 sm:$0xff]   ;;  %v5217_v20 = vld [vmem:[%s5629_s0] ss:$48 sps:$4 sm:$0xff]  }
 0x12b   :  { %2837 = vmatprep.subr.bf16.mxu1 %v4792_v21  ;;  %v5218_v21 = vld [vmem:[%s5629_s0 + $0x8] ss:$48 sps:$4 sm:$0xff]  }
 0x12d   :  { %2795 = vmatpush1.bf16.msra.mxu0 %v4787_v24  ;;  %v4885_v24 = vld [vmem:[#allocation2 + $0x4ac] ss:$16 sps:$4 sm:$0xff]  }
 0x12e   :  { %2838 = vmatpush1.bf16.msra.mxu1 %v4790_v25  ;;  %2796 = vmatprep.subr.bf16.mxu0 %v4795_v26  ;;  %v4888_v25 = vld [vmem:[#allocation2 + $0x6ac] ss:$16 sps:$4 sm:$0xff]   ;;  %v5219_v26 = vld [vmem:[%s5629_s0 + $0x14] ss:$48 sps:$4 sm:$0xff]  }
 0x12f   :  { %2839 = vmatprep.subr.bf16.mxu1 %v4798_v27  ;;  %v5220_v27 = vld [vmem:[%s5629_s0 + $0x1c] ss:$48 sps:$4 sm:$0xff]  }
 0x131   :  { %2797 = vmatpush1.bf16.msra.mxu0 %v4793_v28  ;;  %v4883_v28 = vld [vmem:[#allocation2 + $0x4a8] ss:$16 sps:$4 sm:$0xff]  }
 0x132   :  { %2840 = vmatpush1.bf16.msra.mxu1 %v4796_v29  ;;  %2798 = vmatprep.subr.bf16.mxu0 %v4801_v30  ;;  %v4886_v29 = vld [vmem:[#allocation2 + $0x6a8] ss:$16 sps:$4 sm:$0xff]   ;;  %v4891_v30 = vld [vmem:[#allocation2 + $0x48c] ss:$16 sps:$4 sm:$0xff]  }
 0x133   :  { %2841 = vmatprep.subr.bf16.mxu1 %v4804_v31  ;;  %v4894_v31 = vld [vmem:[#allocation2 + $0x68c] ss:$16 sps:$4 sm:$0xff]  }
 0x135   :  { %2799 = vmatpush1.bf16.msra.mxu0 %v4799_v32  ;;  %v4889_v32 = vld [vmem:[#allocation2 + $0x488] ss:$16 sps:$4 sm:$0xff]  }
 0x136   :  { %2842 = vmatpush1.bf16.msra.mxu1 %v4802_v33  ;;  %2800 = vmatprep.subr.bf16.mxu0 %v4807_v34  ;;  %v4892_v33 = vld [vmem:[#allocation2 + $0x688] ss:$16 sps:$4 sm:$0xff]   ;;  %v4897_v34 = vld [vmem:[#allocation2 + $0x46c] ss:$16 sps:$4 sm:$0xff]  }
 0x137   :  { %2843 = vmatprep.subr.bf16.mxu1 %v4810_v35  ;;  %v4900_v35 = vld [vmem:[#allocation2 + $0x66c] ss:$16 sps:$4 sm:$0xff]  }
 0x139   :  { %2801 = vmatpush1.bf16.msra.mxu0 %v4805_v36  ;;  %v4895_v36 = vld [vmem:[#allocation2 + $0x468] ss:$16 sps:$4 sm:$0xff]  }
 0x13a   :  { %2844 = vmatpush1.bf16.msra.mxu1 %v4808_v37  ;;  %2802 = vmatprep.subr.bf16.mxu0 %v4813_v38  ;;  %v4898_v37 = vld [vmem:[#allocation2 + $0x668] ss:$16 sps:$4 sm:$0xff]   ;;  %v4903_v38 = vld [vmem:[#allocation2 + $0x44c] ss:$16 sps:$4 sm:$0xff]  }
 0x13b   :  { %2845 = vmatprep.subr.bf16.mxu1 %v4816_v39  ;;  %v4906_v39 = vld [vmem:[#allocation2 + $0x64c] ss:$16 sps:$4 sm:$0xff]  }
 0x13d   :  { %2803 = vmatpush1.bf16.msra.mxu0 %v4811_v40  ;;  %v4901_v40 = vld [vmem:[#allocation2 + $0x448] ss:$16 sps:$4 sm:$0xff]  }
 0x13e   :  { %2846 = vmatpush1.bf16.msra.mxu1 %v4814_v41  ;;  %2804 = vmatprep.subr.bf16.mxu0 %v4819_v42  ;;  %v4904_v41 = vld [vmem:[#allocation2 + $0x648] ss:$16 sps:$4 sm:$0xff]   ;;  %v4909_v42 = vld [vmem:[#allocation2 + $0x42c] ss:$16 sps:$4 sm:$0xff]  }
 0x13f   :  { %2847 = vmatprep.subr.bf16.mxu1 %v4822_v43  ;;  %v4912_v43 = vld [vmem:[#allocation2 + $0x62c] ss:$16 sps:$4 sm:$0xff]  }
 0x141   :  { %2805 = vmatpush1.bf16.msra.mxu0 %v4817_v44  ;;  %v4907_v44 = vld [vmem:[#allocation2 + $0x428] ss:$16 sps:$4 sm:$0xff]  }
 0x142   :  { %2848 = vmatpush1.bf16.msra.mxu1 %v4820_v45  ;;  %2806 = vmatprep.subr.bf16.mxu0 %v4825_v46  ;;  %v4910_v45 = vld [vmem:[#allocation2 + $0x628] ss:$16 sps:$4 sm:$0xff]   ;;  %v4915_v46 = vld [vmem:[#allocation2 + $0x40c] ss:$16 sps:$4 sm:$0xff]  }
 0x143   :  { %2849 = vmatprep.subr.bf16.mxu1 %v4828_v47  ;;  %v4918_v47 = vld [vmem:[#allocation2 + $0x60c] ss:$16 sps:$4 sm:$0xff]  }
 0x145   :  { %2807 = vmatpush2.bf16.msra.mxu0 %v4823_v48  ;;  %v4913_v48 = vld [vmem:[#allocation2 + $0x408] ss:$16 sps:$4 sm:$0xff]  }
 0x146   :  { %2850 = vmatpush2.bf16.msra.mxu1 %v4826_v49  ;;  %2808 = vmatprep.subr.bf16.mxu0 %v4831_v50  ;;  %v4916_v49 = vld [vmem:[#allocation2 + $0x608] ss:$16 sps:$4 sm:$0xff]   ;;  %v4921_v50 = vld [vmem:[#allocation2 + $0x5ec] ss:$16 sps:$4 sm:$0xff]  }
 0x147   :  { %2851 = vmatprep.subr.bf16.mxu1 %v4834_v51  ;;  %v4924_v51 = vld [vmem:[#allocation2 + $0x7ec] ss:$16 sps:$4 sm:$0xff]  }
 0x149   :  { %2809 = vmatpush2.bf16.msra.mxu0 %v4829_v52  ;;  %v4919_v52 = vld [vmem:[#allocation2 + $0x5e8] ss:$16 sps:$4 sm:$0xff]  }
 0x14a   :  { %2852 = vmatpush2.bf16.msra.mxu1 %v4832_v53  ;;  %2810 = vmatprep.subr.bf16.mxu0 %v4837_v54  ;;  %v4922_v53 = vld [vmem:[#allocation2 + $0x7e8] ss:$16 sps:$4 sm:$0xff]   ;;  %v4927_v54 = vld [vmem:[#allocation2 + $0x5cc] ss:$16 sps:$4 sm:$0xff]  }
 0x14b   :  { %2853 = vmatprep.subr.bf16.mxu1 %v4840_v55  ;;  %v4930_v55 = vld [vmem:[#allocation2 + $0x7cc] ss:$16 sps:$4 sm:$0xff]  }
 0x14d   :  { %2811 = vmatpush2.bf16.msra.mxu0 %v4835_v56  ;;  %v4925_v56 = vld [vmem:[#allocation2 + $0x5c8] ss:$16 sps:$4 sm:$0xff]  }
 0x14e   :  { %2854 = vmatpush2.bf16.msra.mxu1 %v4838_v57  ;;  %2812 = vmatprep.subr.bf16.mxu0 %v4843_v58  ;;  %v4928_v57 = vld [vmem:[#allocation2 + $0x7c8] ss:$16 sps:$4 sm:$0xff]   ;;  %v4933_v58 = vld [vmem:[#allocation2 + $0x5ac] ss:$16 sps:$4 sm:$0xff]  }
 0x14f   :  { %2855 = vmatprep.subr.bf16.mxu1 %v4846_v59  ;;  %v4936_v59 = vld [vmem:[#allocation2 + $0x7ac] ss:$16 sps:$4 sm:$0xff]  }
 0x151   :  { %2813 = vmatpush2.bf16.msra.mxu0 %v4841_v60  ;;  %v4931_v60 = vld [vmem:[#allocation2 + $0x5a8] ss:$16 sps:$4 sm:$0xff]  }
 0x152   :  { %2856 = vmatpush2.bf16.msra.mxu1 %v4844_v61  ;;  %2814 = vmatprep.subr.bf16.mxu0 %v4849_v62  ;;  %v4934_v61 = vld [vmem:[#allocation2 + $0x7a8] ss:$16 sps:$4 sm:$0xff]   ;;  %v4939_v62 = vld [vmem:[#allocation2 + $0x58c] ss:$16 sps:$4 sm:$0xff]  }
 0x153   :  { %2857 = vmatprep.subr.bf16.mxu1 %v4852_v63  ;;  %v4942_v63 = vld [vmem:[#allocation2 + $0x78c] ss:$16 sps:$4 sm:$0xff]  }
 0x155   :  { %2815 = vmatpush2.bf16.msra.mxu0 %v4847_v0  ;;  %v4937_v0 = vld [vmem:[#allocation2 + $0x588] ss:$16 sps:$4 sm:$0xff]  }
 0x156   :  { %2858 = vmatpush2.bf16.msra.mxu1 %v4850_v1  ;;  %2816 = vmatprep.subr.bf16.mxu0 %v4855_v2  ;;  %v4940_v1 = vld [vmem:[#allocation2 + $0x788] ss:$16 sps:$4 sm:$0xff]   ;;  %v4945_v2 = vld [vmem:[#allocation2 + $0x56c] ss:$16 sps:$4 sm:$0xff]  }
 0x157   :  { %2859 = vmatprep.subr.bf16.mxu1 %v4858_v3  ;;  %v4948_v3 = vld [vmem:[#allocation2 + $0x76c] ss:$16 sps:$4 sm:$0xff]  }
 0x159   :  { %2817 = vmatpush2.bf16.msra.mxu0 %v4853_v4  ;;  %v4943_v4 = vld [vmem:[#allocation2 + $0x568] ss:$16 sps:$4 sm:$0xff]  }
 0x15a   :  { %2860 = vmatpush2.bf16.msra.mxu1 %v4856_v5  ;;  %2818 = vmatprep.subr.bf16.mxu0 %v4861_v6  ;;  %v4946_v5 = vld [vmem:[#allocation2 + $0x768] ss:$16 sps:$4 sm:$0xff]   ;;  %v4951_v6 = vld [vmem:[#allocation2 + $0x54c] ss:$16 sps:$4 sm:$0xff]  }
 0x15b   :  { %2861 = vmatprep.subr.bf16.mxu1 %v4864_v7  ;;  %v4954_v7 = vld [vmem:[#allocation2 + $0x74c] ss:$16 sps:$4 sm:$0xff]  }
 0x15d   :  { %2819 = vmatpush2.bf16.msra.mxu0 %v4859_v8  ;;  %v4949_v8 = vld [vmem:[#allocation2 + $0x548] ss:$16 sps:$4 sm:$0xff]  }
 0x15e   :  { %2862 = vmatpush2.bf16.msra.mxu1 %v4862_v9  ;;  %2820 = vmatprep.subr.bf16.mxu0 %v4867_v10  ;;  %v4952_v9 = vld [vmem:[#allocation2 + $0x748] ss:$16 sps:$4 sm:$0xff]   ;;  %v4957_v10 = vld [vmem:[#allocation2 + $0x52c] ss:$16 sps:$4 sm:$0xff]  }
 0x15f   :  { %2863 = vmatprep.subr.bf16.mxu1 %v4870_v11  ;;  %v4960_v11 = vld [vmem:[#allocation2 + $0x72c] ss:$16 sps:$4 sm:$0xff]  }
 0x161   :  { %2821 = vmatpush2.bf16.msra.mxu0 %v4865_v12  ;;  %v4955_v12 = vld [vmem:[#allocation2 + $0x528] ss:$16 sps:$4 sm:$0xff]  }
 0x162   :  { %2864 = vmatpush2.bf16.msra.mxu1 %v4868_v13  ;;  %2876 = vmatprep.subr.bf16.mxu0 %v4873_v14  ;;  %v4958_v13 = vld [vmem:[#allocation2 + $0x728] ss:$16 sps:$4 sm:$0xff]   ;;  %v4963_v14 = vld [vmem:[#allocation2 + $0x50c] ss:$16 sps:$4 sm:$0xff]  }
 0x163   :  { %2919 = vmatprep.subr.bf16.mxu1 %v4876_v15  ;;  %v4966_v15 = vld [vmem:[#allocation2 + $0x70c] ss:$16 sps:$4 sm:$0xff]  }
 0x164   :  { %2823 = vmatmul.mubr.bf16.vlgmr.msra.gmra.mxu0 %v5217_v20  ;;  %v4967_v20 = vld [vmem:[#allocation2 + $0x8e8] ss:$16 sps:$4 sm:$0xff]  }
 0x165   :  { %2866 = vmatmul.mubr.bf16.vlgmr.msra.gmra.mxu1 %v5218_v21  ;;  %2877 = vmatpush1.bf16.msra.mxu0 %v4871_v16  ;;  %v4961_v16 = vld [vmem:[#allocation2 + $0x508] ss:$16 sps:$4 sm:$0xff]  }
 0x166   :  { %2920 = vmatpush1.bf16.msra.mxu1 %v4874_v17  ;;  %2878 = vmatprep.subr.bf16.mxu0 %v4879_v18  ;;  %v4964_v17 = vld [vmem:[#allocation2 + $0x708] ss:$16 sps:$4 sm:$0xff]   ;;  %v4969_v18 = vld [vmem:[#allocation2 + $0x8ec] ss:$16 sps:$4 sm:$0xff]  }
 0x167   :  { %2921 = vmatprep.subr.bf16.mxu1 %v4882_v19  ;;  %2908 = vmatprep.mubr.bf16.mxu0 %v5219_v26  ;;  %v4972_v19 = vld [vmem:[#allocation2 + $0xaec] ss:$16 sps:$4 sm:$0xff]   ;;  %v4970_v21 = vld [vmem:[#allocation2 + $0xae8] ss:$16 sps:$4 sm:$0xff]  }
 0x168   :  { %2951 = vmatprep.mubr.bf16.mxu1 %v5220_v27  ;;  %v4973_v26 = vld [vmem:[#allocation2 + $0x8c8] ss:$16 sps:$4 sm:$0xff]  }
 0x169   :  { %2879 = vmatpush1.bf16.msra.mxu0 %v4877_v22  ;;  %v4975_v22 = vld [vmem:[#allocation2 + $0x8cc] ss:$16 sps:$4 sm:$0xff]   ;;  %v4976_v27 = vld [vmem:[#allocation2 + $0xac8] ss:$16 sps:$4 sm:$0xff]  }
 0x16a   :  { %2922 = vmatpush1.bf16.msra.mxu1 %v4880_v23  ;;  %2880 = vmatprep.subr.bf16.mxu0 %v4885_v24  ;;  %v4978_v23 = vld [vmem:[#allocation2 + $0xacc] ss:$16 sps:$4 sm:$0xff]   ;;  %v5221_v24 = vld [vmem:[%s5629_s0 + $0x10] ss:$48 sps:$4 sm:$0xff]  }
 0x16b   :  { %2923 = vmatprep.subr.bf16.mxu1 %v4888_v25  ;;  %v5222_v25 = vld [vmem:[%s5629_s0 + $0x18] ss:$48 sps:$4 sm:$0xff]  }
 0x16d   :  { %2881 = vmatpush1.bf16.msra.mxu0 %v4883_v28  ;;  %v4981_v28 = vld [vmem:[#allocation2 + $0x8ac] ss:$16 sps:$4 sm:$0xff]  }
 0x16e   :  { %2924 = vmatpush1.bf16.msra.mxu1 %v4886_v29  ;;  %2882 = vmatprep.subr.bf16.mxu0 %v4891_v30  ;;  %v4984_v29 = vld [vmem:[#allocation2 + $0xaac] ss:$16 sps:$4 sm:$0xff]   ;;  %v5223_v30 = vld [vmem:[%s5629_s0 + $0x24] ss:$48 sps:$4 sm:$0xff]  }
 0x16f   :  { %2925 = vmatprep.subr.bf16.mxu1 %v4894_v31  ;;  %v5224_v31 = vld [vmem:[%s5629_s0 + $0x2c] ss:$48 sps:$4 sm:$0xff]  }
 0x171   :  { %2883 = vmatpush1.bf16.msra.mxu0 %v4889_v32  ;;  %v4979_v32 = vld [vmem:[#allocation2 + $0x8a8] ss:$16 sps:$4 sm:$0xff]  }
 0x172   :  { %2926 = vmatpush1.bf16.msra.mxu1 %v4892_v33  ;;  %2884 = vmatprep.subr.bf16.mxu0 %v4897_v34  ;;  %v4982_v33 = vld [vmem:[#allocation2 + $0xaa8] ss:$16 sps:$4 sm:$0xff]   ;;  %v4987_v34 = vld [vmem:[#allocation2 + $0x88c] ss:$16 sps:$4 sm:$0xff]  }
 0x173   :  { %2927 = vmatprep.subr.bf16.mxu1 %v4900_v35  ;;  %v4990_v35 = vld [vmem:[#allocation2 + $0xa8c] ss:$16 sps:$4 sm:$0xff]  }
 0x175   :  { %2885 = vmatpush1.bf16.msra.mxu0 %v4895_v36  ;;  %v4985_v36 = vld [vmem:[#allocation2 + $0x888] ss:$16 sps:$4 sm:$0xff]  }
 0x176   :  { %2928 = vmatpush1.bf16.msra.mxu1 %v4898_v37  ;;  %2886 = vmatprep.subr.bf16.mxu0 %v4903_v38  ;;  %v4988_v37 = vld [vmem:[#allocation2 + $0xa88] ss:$16 sps:$4 sm:$0xff]   ;;  %v4993_v38 = vld [vmem:[#allocation2 + $0x86c] ss:$16 sps:$4 sm:$0xff]  }
 0x177   :  { %2929 = vmatprep.subr.bf16.mxu1 %v4906_v39  ;;  %v4996_v39 = vld [vmem:[#allocation2 + $0xa6c] ss:$16 sps:$4 sm:$0xff]  }
 0x179   :  { %2887 = vmatpush1.bf16.msra.mxu0 %v4901_v40  ;;  %v4991_v40 = vld [vmem:[#allocation2 + $0x868] ss:$16 sps:$4 sm:$0xff]  }
 0x17a   :  { %2930 = vmatpush1.bf16.msra.mxu1 %v4904_v41  ;;  %2888 = vmatprep.subr.bf16.mxu0 %v4909_v42  ;;  %v4994_v41 = vld [vmem:[#allocation2 + $0xa68] ss:$16 sps:$4 sm:$0xff]   ;;  %v4999_v42 = vld [vmem:[#allocation2 + $0x84c] ss:$16 sps:$4 sm:$0xff]  }
 0x17b   :  { %2931 = vmatprep.subr.bf16.mxu1 %v4912_v43  ;;  %v5002_v43 = vld [vmem:[#allocation2 + $0xa4c] ss:$16 sps:$4 sm:$0xff]  }
 0x17d   :  { %2889 = vmatpush1.bf16.msra.mxu0 %v4907_v44  ;;  %v4997_v44 = vld [vmem:[#allocation2 + $0x848] ss:$16 sps:$4 sm:$0xff]  }
 0x17e   :  { %2932 = vmatpush1.bf16.msra.mxu1 %v4910_v45  ;;  %2890 = vmatprep.subr.bf16.mxu0 %v4915_v46  ;;  %v5000_v45 = vld [vmem:[#allocation2 + $0xa48] ss:$16 sps:$4 sm:$0xff]   ;;  %v5005_v46 = vld [vmem:[#allocation2 + $0x82c] ss:$16 sps:$4 sm:$0xff]  }
 0x17f   :  { %2933 = vmatprep.subr.bf16.mxu1 %v4918_v47  ;;  %v5008_v47 = vld [vmem:[#allocation2 + $0xa2c] ss:$16 sps:$4 sm:$0xff]  }
 0x181   :  { %2891 = vmatpush1.bf16.msra.mxu0 %v4913_v48  ;;  %v5003_v48 = vld [vmem:[#allocation2 + $0x828] ss:$16 sps:$4 sm:$0xff]  }
 0x182   :  { %2934 = vmatpush1.bf16.msra.mxu1 %v4916_v49  ;;  %2892 = vmatprep.subr.bf16.mxu0 %v4921_v50  ;;  %v5006_v49 = vld [vmem:[#allocation2 + $0xa28] ss:$16 sps:$4 sm:$0xff]   ;;  %v5011_v50 = vld [vmem:[#allocation2 + $0x80c] ss:$16 sps:$4 sm:$0xff]  }
 0x183   :  { %2935 = vmatprep.subr.bf16.mxu1 %v4924_v51  ;;  %v5014_v51 = vld [vmem:[#allocation2 + $0xa0c] ss:$16 sps:$4 sm:$0xff]  }
 0x185   :  { %2893 = vmatpush2.bf16.msra.mxu0 %v4919_v52  ;;  %v5009_v52 = vld [vmem:[#allocation2 + $0x808] ss:$16 sps:$4 sm:$0xff]  }
 0x186   :  { %2936 = vmatpush2.bf16.msra.mxu1 %v4922_v53  ;;  %2894 = vmatprep.subr.bf16.mxu0 %v4927_v54  ;;  %v5012_v53 = vld [vmem:[#allocation2 + $0xa08] ss:$16 sps:$4 sm:$0xff]   ;;  %v5017_v54 = vld [vmem:[#allocation2 + $0x9ec] ss:$16 sps:$4 sm:$0xff]  }
 0x187   :  { %2937 = vmatprep.subr.bf16.mxu1 %v4930_v55  ;;  %v5020_v55 = vld [vmem:[#allocation2 + $0xbec] ss:$16 sps:$4 sm:$0xff]  }
 0x189   :  { %2895 = vmatpush2.bf16.msra.mxu0 %v4925_v56  ;;  %v5015_v56 = vld [vmem:[#allocation2 + $0x9e8] ss:$16 sps:$4 sm:$0xff]  }
 0x18a   :  { %2938 = vmatpush2.bf16.msra.mxu1 %v4928_v57  ;;  %2896 = vmatprep.subr.bf16.mxu0 %v4933_v58  ;;  %v5018_v57 = vld [vmem:[#allocation2 + $0xbe8] ss:$16 sps:$4 sm:$0xff]   ;;  %v5023_v58 = vld [vmem:[#allocation2 + $0x9cc] ss:$16 sps:$4 sm:$0xff]  }
 0x18b   :  { %2939 = vmatprep.subr.bf16.mxu1 %v4936_v59  ;;  %v5026_v59 = vld [vmem:[#allocation2 + $0xbcc] ss:$16 sps:$4 sm:$0xff]  }
 0x18d   :  { %2897 = vmatpush2.bf16.msra.mxu0 %v4931_v60  ;;  %v5021_v60 = vld [vmem:[#allocation2 + $0x9c8] ss:$16 sps:$4 sm:$0xff]  }
 0x18e   :  { %2940 = vmatpush2.bf16.msra.mxu1 %v4934_v61  ;;  %2898 = vmatprep.subr.bf16.mxu0 %v4939_v62  ;;  %v5024_v61 = vld [vmem:[#allocation2 + $0xbc8] ss:$16 sps:$4 sm:$0xff]   ;;  %v5029_v62 = vld [vmem:[#allocation2 + $0x9ac] ss:$16 sps:$4 sm:$0xff]  }
 0x18f   :  { %2941 = vmatprep.subr.bf16.mxu1 %v4942_v63  ;;  %v5032_v63 = vld [vmem:[#allocation2 + $0xbac] ss:$16 sps:$4 sm:$0xff]  }
 0x191   :  { %2899 = vmatpush2.bf16.msra.mxu0 %v4937_v0  ;;  %v5553_v0 = vpop.f32.mrf.mxu0 }
 0x192   :  { %2942 = vmatpush2.bf16.msra.mxu1 %v4940_v1  ;;  %2900 = vmatprep.subr.bf16.mxu0 %v4945_v2  ;;  %v5555_v1 = vpop.f32.mrf.mxu1  ;;  %v5027_v2 = vld [vmem:[#allocation2 + $0x9a8] ss:$16 sps:$4 sm:$0xff]  }
 0x193   :  { %2943 = vmatprep.subr.bf16.mxu1 %v4948_v3  ;;  %v5030_v3 = vld [vmem:[#allocation2 + $0xba8] ss:$16 sps:$4 sm:$0xff]  }
 0x195   :  { %2901 = vmatpush2.bf16.msra.mxu0 %v4943_v4  ;;  %v5035_v4 = vld [vmem:[#allocation2 + $0x98c] ss:$16 sps:$4 sm:$0xff]  }
 0x196   :  { %2944 = vmatpush2.bf16.msra.mxu1 %v4946_v5  ;;  %2902 = vmatprep.subr.bf16.mxu0 %v4951_v6  ;;  %v5038_v5 = vld [vmem:[#allocation2 + $0xb8c] ss:$16 sps:$4 sm:$0xff]   ;;  %v532_v6 = vlaneseq }
 0x197   :  { %2945 = vmatprep.subr.bf16.mxu1 %v4954_v7  ;;  %v2568_v7 = vpop.f32.mrf.mxu0 }
 0x199   :  { %2903 = vmatpush2.bf16.msra.mxu0 %v4949_v8  ;;  %v2611_v8 = vpop.f32.mrf.mxu1 }
 0x19a   :  { %2946 = vmatpush2.bf16.msra.mxu1 %v4952_v9  ;;  %2904 = vmatprep.subr.bf16.mxu0 %v4957_v10  ;;  %v5033_v9 = vld [vmem:[#allocation2 + $0x988] ss:$16 sps:$4 sm:$0xff]  }
 0x19b   :  { %2947 = vmatprep.subr.bf16.mxu1 %v4960_v11  ;;  %v5036_v10 = vld [vmem:[#allocation2 + $0xb88] ss:$16 sps:$4 sm:$0xff]   ;;  %v5041_v11 = vld [vmem:[#allocation2 + $0x96c] ss:$16 sps:$4 sm:$0xff]  }
 0x19d   :  { %2905 = vmatpush2.bf16.msra.mxu0 %v4955_v12  ;;  %v5044_v12 = vld [vmem:[#allocation2 + $0xb6c] ss:$16 sps:$4 sm:$0xff]  }
 0x19e   :  { %2948 = vmatpush2.bf16.msra.mxu1 %v4958_v13  ;;  %2906 = vmatprep.subr.bf16.mxu0 %v4963_v14  ;;  %v5557_v13 = vshrl.u32 %v532_v6, 7  ;;  %v5559_v14 = vpop.f32.mrf.mxu0 }
 0x19f   :  { %2949 = vmatprep.subr.bf16.mxu1 %v4966_v15  ;;  %v5561_v15 = vpop.f32.mrf.mxu1 }
 0x1a1   :  { %2907 = vmatpush2.bf16.msra.mxu0 %v4961_v16  ;;  %v5039_v16 = vld [vmem:[#allocation2 + $0x968] ss:$16 sps:$4 sm:$0xff]  }
 0x1a2   :  { %2950 = vmatpush2.bf16.msra.mxu1 %v4964_v17  ;;  %2962 = vmatprep.subr.bf16.mxu0 %v4969_v18  ;;  %v5042_v17 = vld [vmem:[#allocation2 + $0xb68] ss:$16 sps:$4 sm:$0xff]   ;;  %v5047_v18 = vld [vmem:[#allocation2 + $0x94c] ss:$16 sps:$4 sm:$0xff]  }
 0x1a3   :  { %3005 = vmatprep.subr.bf16.mxu1 %v4972_v19  ;;  %v5050_v19 = vld [vmem:[#allocation2 + $0xb4c] ss:$16 sps:$4 sm:$0xff]  }
 0x1a4   :  { %2909 = vmatmul.mubr.bf16.vlgmr.msra.gmra.mxu0 %v5221_v24  ;;  %v5045_v24 = vld [vmem:[#allocation2 + $0x948] ss:$16 sps:$4 sm:$0xff]  }
 0x1a5   :  { %2952 = vmatmul.mubr.bf16.vlgmr.msra.gmra.mxu1 %v5222_v25  ;;  %2963 = vmatpush1.bf16.msra.mxu0 %v4967_v20  ;;  %v5564_v20 = vsub.s32 1, %v5557_v13  ;;  %v5048_v25 = vld [vmem:[#allocation2 + $0xb48] ss:$16 sps:$4 sm:$0xff]  }
 0x1a6   :  { %3006 = vmatpush1.bf16.msra.mxu1 %v4970_v21  ;;  %2964 = vmatprep.subr.bf16.mxu0 %v4975_v22  ;;  %v5566_v21 = vld [vmem:[#allocation4] sm:$0xf]  ;;  %v2572_v22 = vpop.f32.mrf.mxu0 }
 0x1a7   :  { %3007 = vmatprep.subr.bf16.mxu1 %v4978_v23  ;;  %2994 = vmatprep.mubr.bf16.mxu0 %v5223_v30  ;;  %v2615_v23 = vpop.f32.mrf.mxu1  ;;  %v539_v30 = vrot.slane %v5566_v21, %v5564_v20 }
 0x1a8   :  { %3037 = vmatprep.mubr.bf16.mxu1 %v5224_v31  ;;  %v5051_v31 = vld [vmem:[#allocation2 + $0x928] ss:$16 sps:$4 sm:$0xff]  }
 0x1a9   :  { %2965 = vmatpush1.bf16.msra.mxu0 %v4973_v26  ;;  %v5568_v26 = vpop.f32.mrf.mxu0 }
 0x1aa   :  { %3008 = vmatpush1.bf16.msra.mxu1 %v4976_v27  ;;  %2966 = vmatprep.subr.bf16.mxu0 %v4981_v28  ;;  %v5570_v27 = vpop.f32.mrf.mxu1  ;;  %v5053_v28 = vld [vmem:[#allocation2 + $0x92c] ss:$16 sps:$4 sm:$0xff]  }
 0x1ab   :  { %3009 = vmatprep.subr.bf16.mxu1 %v4984_v29  ;;  %v5056_v29 = vld [vmem:[#allocation2 + $0xb2c] ss:$16 sps:$4 sm:$0xff]  }
 0x1ad   :  { %2967 = vmatpush1.bf16.msra.mxu0 %v4979_v32  ;;  %v5054_v32 = vld [vmem:[#allocation2 + $0xb28] ss:$16 sps:$4 sm:$0xff]  }
 0x1ae   :  { %3010 = vmatpush1.bf16.msra.mxu1 %v4982_v33  ;;  %2968 = vmatprep.subr.bf16.mxu0 %v4987_v34  ;;  %v2654_v33 = vpop.f32.mrf.mxu0  ;;  %v2697_v34 = vpop.f32.mrf.mxu1 }
 0x1af   :  { %3011 = vmatprep.subr.bf16.mxu1 %v4990_v35  ;;  %v5059_v35 = vld [vmem:[#allocation2 + $0x90c] ss:$16 sps:$4 sm:$0xff]  }
 0x1b1   :  { %2969 = vmatpush1.bf16.msra.mxu0 %v4985_v36  ;;  %v5062_v36 = vld [vmem:[#allocation2 + $0xb0c] ss:$16 sps:$4 sm:$0xff]  }
 0x1b2   :  { %3012 = vmatpush1.bf16.msra.mxu1 %v4988_v37  ;;  %2970 = vmatprep.subr.bf16.mxu0 %v4993_v38  ;;  %v2569_v37 = vadd.f32 %v2568_v7, %v539_v30  ;;  %v5057_v38 = vld [vmem:[#allocation2 + $0x908] ss:$16 sps:$4 sm:$0xff]  }
 0x1b3   :  { %3013 = vmatprep.subr.bf16.mxu1 %v4996_v39  ;;  %v5060_v39 = vld [vmem:[#allocation2 + $0xb08] ss:$16 sps:$4 sm:$0xff]  }
 0x1b5   :  { %2971 = vmatpush1.bf16.msra.mxu0 %v4991_v40  ;;  %v5574_v40 = vpop.f32.mrf.mxu0 }
 0x1b6   :  { %3014 = vmatpush1.bf16.msra.mxu1 %v4994_v41  ;;  %2972 = vmatprep.subr.bf16.mxu0 %v4999_v42  ;;  %v5576_v41 = vpop.f32.mrf.mxu1  ;;  %v5065_v42 = vld [vmem:[#allocation6 + $0x74] ss:$8 sps:$4 sm:$0xff]  }
 0x1b7   :  { %3015 = vmatprep.subr.bf16.mxu1 %v5002_v43  ;;  %v2612_v43 = vadd.f32 %v2611_v8, %v2569_v37  ;;  %v5123_v37 = vld [vmem:[#allocation6 + $0x130] ss:$8 sps:$4 sm:$0xff]  }
 0x1b9   :  { %2973 = vmatpush1.bf16.msra.mxu0 %v4997_v44  ;;  %v2573_v44 = vadd.f32 %v2572_v22, %v539_v30  ;;  %v5114_v22 = vld [vmem:[#allocation6 + $0x160] ss:$8 sps:$4 sm:$0xff]  }
 0x1ba   :  { %3016 = vmatpush1.bf16.msra.mxu1 %v5000_v45  ;;  %2974 = vmatprep.subr.bf16.mxu0 %v5005_v46  ;;  %v2655_v45 = vadd.f32 %v2654_v33, %v2612_v43  ;;  %v5063_v46 = vld [vmem:[#allocation6 + $0x70] ss:$8 sps:$4 sm:$0xff]   ;;  %v5078_v30 = vld [vmem:[#allocation6 + $0x20] ss:$8 sps:$4 sm:$0xff]  }
 0x1bb   :  { %3017 = vmatprep.subr.bf16.mxu1 %v5008_v47  ;;  %v2658_v47 = vpop.f32.mrf.mxu0  ;;  %v5120_v33 = vld [vmem:[#allocation6 + $0x140] ss:$8 sps:$4 sm:$0xff]  }
 0x1bc   :  { %v5126_v43 = vld [vmem:[#allocation6 + $0x120] ss:$8 sps:$4 sm:$0xff]  }
 0x1bd   :  { %2975 = vmatpush1.bf16.msra.mxu0 %v5003_v48  ;;  %v2701_v48 = vpop.f32.mrf.mxu1 }
 0x1be   :  { %3018 = vmatpush1.bf16.msra.mxu1 %v5006_v49  ;;  %2976 = vmatprep.subr.bf16.mxu0 %v5011_v50  ;;  %v5068_v49 = vld [vmem:[#allocation6 + $0x64] ss:$8 sps:$4 sm:$0xff]   ;;  %v2616_v50 = vadd.f32 %v2615_v23, %v2573_v44  ;;  %v5087_v44 = vld [vmem:[#allocation6 + $0xf0] ss:$8 sps:$4 sm:$0xff]  }
 0x1bf   :  { %3019 = vmatprep.subr.bf16.mxu1 %v5014_v51 }
 0x1c1   :  { %2977 = vmatpush1.bf16.msra.mxu0 %v5009_v52 }
 0x1c2   :  { %3020 = vmatpush1.bf16.msra.mxu1 %v5012_v53  ;;  %2978 = vmatprep.subr.bf16.mxu0 %v5017_v54  ;;  %v5225_v53 = vld [vmem:[%s5629_s0 + $0x20] ss:$48 sps:$4 sm:$0xff]   ;;  %v5226_v54 = vld [vmem:[%s5629_s0 + $0x28] ss:$48 sps:$4 sm:$0xff]  }
 0x1c3   :  { %3021 = vmatprep.subr.bf16.mxu1 %v5020_v55  ;;  %v2698_v55 = vadd.f32 %v2697_v34, %v2655_v45  ;;  %v5081_v34 = vld [vmem:[#allocation6 + $0x10] ss:$8 sps:$4 sm:$0xff]   ;;  %v5131_v45 = vld [vmem:[#allocation6 + $0x114] ss:$8 sps:$4 sm:$0xff]  }
 0x1c5   :  { %2979 = vmatpush2.bf16.msra.mxu0 %v5015_v56  ;;  %v2659_v56 = vadd.f32 %v2658_v47, %v2616_v50  ;;  %v5593_v47 = vsub.s32 0, %v5557_v13  ;;  %v5134_v50 = vld [vmem:[#allocation6 + $0x104] ss:$8 sps:$4 sm:$0xff]  }
 0x1c6   :  { %3022 = vmatpush2.bf16.msra.mxu1 %v5018_v57  ;;  %2980 = vmatprep.subr.bf16.mxu0 %v5023_v58  ;;  %v5066_v57 = vld [vmem:[#allocation6 + $0x60] ss:$8 sps:$4 sm:$0xff]  }
 0x1c7   :  { %3023 = vmatprep.subr.bf16.mxu1 %v5026_v59 }
 0x1c9   :  { %2981 = vmatpush2.bf16.msra.mxu0 %v5021_v60  ;;  %v5071_v60 = vld [vmem:[#allocation6 + $0x54] ss:$8 sps:$4 sm:$0xff]  }
 0x1ca   :  { %3024 = vmatpush2.bf16.msra.mxu1 %v5024_v61  ;;  %2982 = vmatprep.subr.bf16.mxu0 %v5029_v62 }
 0x1cb   :  { %3025 = vmatprep.subr.bf16.mxu1 %v5032_v63 }
 0x1cd   :  { %2983 = vmatpush2.bf16.msra.mxu0 %v5027_v2  ;;  %v2702_v2 = vadd.f32 %v2701_v48, %v2659_v56  ;;  %v5129_v48 = vld [vmem:[#allocation6 + $0x110] ss:$8 sps:$4 sm:$0xff]  }
 0x1ce   :  { %3026 = vmatpush2.bf16.msra.mxu1 %v5030_v3  ;;  %2984 = vmatprep.subr.bf16.mxu0 %v5035_v4  ;;  %v5069_v3 = vld [vmem:[#allocation6 + $0x50] ss:$8 sps:$4 sm:$0xff]  }
 0x1cf   :  { %3027 = vmatprep.subr.bf16.mxu1 %v5038_v5  ;;  %v5074_v5 = vld [vmem:[#allocation6 + $0x44] ss:$8 sps:$4 sm:$0xff]   ;;  %v5093_v56 = vld [vmem:[#allocation6 + $0xd0] ss:$8 sps:$4 sm:$0xff]  }
 0x1d1   :  { %2985 = vmatpush2.bf16.msra.mxu0 %v5033_v9 }
 0x1d2   :  { %3028 = vmatpush2.bf16.msra.mxu1 %v5036_v10  ;;  %2986 = vmatprep.subr.bf16.mxu0 %v5041_v11  ;;  %v5072_v10 = vld [vmem:[#allocation6 + $0x40] ss:$8 sps:$4 sm:$0xff]   ;;  %v5111_v11 = vld [vmem:[#allocation6 + $0x170] ss:$8 sps:$4 sm:$0xff]  }
 0x1d3   :  { %3029 = vmatprep.subr.bf16.mxu1 %v5044_v12  ;;  %v5113_v12 = vld [vmem:[#allocation6 + $0x174] ss:$8 sps:$4 sm:$0xff]  }
 0x1d5   :  { %2987 = vmatpush2.bf16.msra.mxu0 %v5039_v16  ;;  %v5077_v16 = vld [vmem:[#allocation6 + $0x34] ss:$8 sps:$4 sm:$0xff]  }
 0x1d6   :  { %3030 = vmatpush2.bf16.msra.mxu1 %v5042_v17  ;;  %2988 = vmatprep.subr.bf16.mxu0 %v5047_v18  ;;  %v5116_v17 = vld [vmem:[#allocation6 + $0x164] ss:$8 sps:$4 sm:$0xff]  }
 0x1d7   :  { %3031 = vmatprep.subr.bf16.mxu1 %v5050_v19 }
 0x1d9   :  { %2989 = vmatpush2.bf16.msra.mxu0 %v5045_v24  ;;  %v5075_v24 = vld [vmem:[#allocation6 + $0x30] ss:$8 sps:$4 sm:$0xff]  }
 0x1da   :  { %3032 = vmatpush2.bf16.msra.mxu1 %v5048_v25  ;;  %2990 = vmatprep.subr.bf16.mxu0 %v5053_v28  ;;  %v5119_v25 = vld [vmem:[#allocation6 + $0x154] ss:$8 sps:$4 sm:$0xff]   ;;  %v5080_v28 = vld [vmem:[#allocation6 + $0x24] ss:$8 sps:$4 sm:$0xff]  }
 0x1db   :  { %3033 = vmatprep.subr.bf16.mxu1 %v5056_v29  ;;  %v5117_v29 = vld [vmem:[#allocation6 + $0x150] ss:$8 sps:$4 sm:$0xff]  }
 0x1dd   :  { %2991 = vmatpush2.bf16.msra.mxu0 %v5051_v31  ;;  %v5122_v31 = vld [vmem:[#allocation6 + $0x144] ss:$8 sps:$4 sm:$0xff]  }
 0x1de   :  { %3034 = vmatpush2.bf16.msra.mxu1 %v5054_v32  ;;  %2992 = vmatprep.subr.bf16.mxu0 %v5059_v35  ;;  %v5083_v32 = vld [vmem:[#allocation6 + $0x14] ss:$8 sps:$4 sm:$0xff]  }
 0x1df   :  { %3035 = vmatprep.subr.bf16.mxu1 %v5062_v36  ;;  %v5125_v35 = vld [vmem:[#allocation6 + $0x134] ss:$8 sps:$4 sm:$0xff]   ;;  %v5086_v36 = vld [vmem:[#allocation6 + $0x4] ss:$8 sps:$4 sm:$0xff]  }
 0x1e1   :  { %2993 = vmatpush2.bf16.msra.mxu0 %v5057_v38  ;;  %v5084_v38 = vld [vmem:[#allocation6] ss:$8 sps:$4 sm:$0xff]  }
 0x1e2   :  { %3036 = vmatpush2.bf16.msra.mxu1 %v5060_v39  ;;  %3456 = vmatprep.subr.bf16.mxu0 %v5065_v42  ;;  %v5128_v39 = vld [vmem:[#allocation6 + $0x124] ss:$8 sps:$4 sm:$0xff]   ;;  %v5089_v42 = vld [vmem:[#allocation6 + $0xf4] ss:$8 sps:$4 sm:$0xff]  }
 0x1e3   :  { %3499 = vmatprep.subr.bf16.mxu1 %v5113_v12  ;;  %v5102_v12 = vld [vmem:[#allocation6 + $0xa0] ss:$8 sps:$4 sm:$0xff]  }
 0x1e4   :  { %v5578_v51 = vpop.f32.mrf.mxu0  ;;  %2995 = vmatmul.mubr.bf16.vlgmr.msra.gmra.mxu0 %v5225_v53  ;;  %v5095_v53 = vld [vmem:[#allocation6 + $0xd4] ss:$8 sps:$4 sm:$0xff]  }
 0x1e5   :  { %v5580_v52 = vpop.f32.mrf.mxu1  ;;  %3038 = vmatmul.mubr.bf16.vlgmr.msra.gmra.mxu1 %v5226_v54  ;;  %3457 = vmatpush1.bf16.msra.mxu0 %v5063_v46  ;;  %v5092_v46 = vld [vmem:[#allocation6 + $0xe4] ss:$8 sps:$4 sm:$0xff]   ;;  %v535_v54 = vrot.slane %v5566_v21, %v5593_v47 }
 0x1e6   :  { %v2740_v58 = vpop.f32.mrf.mxu0  ;;  %3458 = vmatprep.subr.bf16.mxu0 %v5068_v49  ;;  %3500 = vmatpush1.bf16.msra.mxu1 %v5111_v11  ;;  %v5090_v49 = vld [vmem:[#allocation6 + $0xe0] ss:$8 sps:$4 sm:$0xff]  }
 0x1e7   :  { %v2783_v59 = vpop.f32.mrf.mxu1  ;;  %v2741_v61 = vadd.f32 %v2740_v58, %v2698_v55  ;;  %3501 = vmatprep.subr.bf16.mxu1 %v5116_v17  ;;  %v5132_v55 = vld [vmem:[#allocation6 + $0x100] ss:$8 sps:$4 sm:$0xff]   ;;  %v2571_v58 = vadd.f32 %v5559_v14, %v535_v54  ;;  %v5107_v17 = vld [vmem:[#allocation6 + $0x94] ss:$8 sps:$4 sm:$0xff]  }
 0x1e8   :  { %v5588_v62 = vpop.f32.mrf.mxu0  ;;  %v5138_v14 = vld [vmem:[#allocation6 + $0x1e0] ss:$8 sps:$4 sm:$0xff]  }
 0x1e9   :  { %v5590_v63 = vpop.f32.mrf.mxu1  ;;  %3459 = vmatpush1.bf16.msra.mxu0 %v5066_v57  ;;  %v2784_v6 = vadd.f32 %v2783_v59, %v2741_v61  ;;  %v5137_v57 = vld [vmem:[#allocation6 + $0x1f4] ss:$8 sps:$4 sm:$0xff]   ;;  %v5098_v59 = vld [vmem:[#allocation6 + $0xc4] ss:$8 sps:$4 sm:$0xff]   ;;  %v5135_v61 = vld [vmem:[#allocation6 + $0x1f0] ss:$8 sps:$4 sm:$0xff]  }
 0x1ea   :  { %v2744_v4 = vpop.f32.mrf.mxu0  ;;  %3460 = vmatprep.subr.bf16.mxu0 %v5071_v60  ;;  %3502 = vmatpush1.bf16.msra.mxu1 %v5114_v22  ;;  %v2567_v60 = vadd.f32 %v5553_v0, %v535_v54  ;;  %v5143_v0 = vld [vmem:[#allocation6 + $0x1d4] ss:$8 sps:$4 sm:$0xff]   ;;  %v5110_v22 = vld [vmem:[#allocation6 + $0x84] ss:$8 sps:$4 sm:$0xff]  }
 0x1eb   :  { %v2745_v7 = vadd.f32 %v2744_v4, %v2702_v2  ;;  %v2787_v8 = vpop.f32.mrf.mxu1  ;;  %v3049_v18 = vmax.f32 %v2784_v6, 0.0  ;;  %3503 = vmatprep.subr.bf16.mxu1 %v5119_v25  ;;  %v5096_v2 = vld [vmem:[#allocation6 + $0xc0] ss:$8 sps:$4 sm:$0xff]   ;;  %v2614_v4 = vadd.f32 %v5561_v15, %v2571_v58  ;;  %v5141_v15 = vld [vmem:[#allocation6 + $0x1d0] ss:$8 sps:$4 sm:$0xff]  }
 0x1ec   :  { %v2610_v6 = vadd.f32 %v5555_v1, %v2567_v60  ;;  %v5146_v1 = vld [vmem:[#allocation6 + $0x1c4] ss:$8 sps:$4 sm:$0xff]   ;;  %v5185_v54 = vld [vmem:[#allocation9 + $0xf4] ss:$8 sps:$4 sm:$0xff]  }
 0x1ed   :  { %v2788_v9 = vadd.f32 %v2787_v8, %v2745_v7  ;;  %3461 = vmatpush1.bf16.msra.mxu0 %v5069_v3  ;;  %v5140_v3 = vld [vmem:[#allocation6 + $0x1e4] ss:$8 sps:$4 sm:$0xff]   ;;  %v2657_v7 = vadd.f32 %v5574_v40, %v2614_v4  ;;  %v5099_v8 = vld [vmem:[#allocation6 + $0xb0] ss:$8 sps:$4 sm:$0xff]  }
 0x1ee   :  { %3462 = vmatprep.subr.bf16.mxu0 %v5074_v5  ;;  %3504 = vmatpush1.bf16.msra.mxu1 %v5117_v29  ;;  %v5101_v5 = vld [vmem:[#allocation6 + $0xb4] ss:$8 sps:$4 sm:$0xff]   ;;  %v5152_v29 = vld [vmem:[#allocation6 + $0x1a4] ss:$8 sps:$4 sm:$0xff]  }
 0x1ef   :  { %v3053_v19 = vmax.f32 %v2788_v9, 0.0  ;;  %3505 = vmatprep.subr.bf16.mxu1 %v5122_v31  ;;  %v2653_v9 = vadd.f32 %v5568_v26, %v2610_v6  ;;  %v2700_v11 = vadd.f32 %v5576_v41, %v2657_v7  ;;  %v5144_v26 = vld [vmem:[#allocation6 + $0x1c0] ss:$8 sps:$4 sm:$0xff]   ;;  %v5153_v31 = vld [vmem:[#allocation6 + $0x190] ss:$8 sps:$4 sm:$0xff]   ;;  %v546_v6 = vsub.s32 3, %v5557_v13 }
 0x1f0   :  { %v5188_v58 = vld [vmem:[#allocation9 + $0xe4] ss:$8 sps:$4 sm:$0xff]  }
 0x1f1   :  { %v3057_v23 = vpack.c.bf16 %v3053_v19, %v3049_v18  ;;  %3463 = vmatpush1.bf16.msra.mxu0 %v5072_v10  ;;  %v5104_v10 = vld [vmem:[#allocation6 + $0xa4] ss:$8 sps:$4 sm:$0xff]   ;;  %v2696_v40 = vadd.f32 %v5570_v27, %v2653_v9  ;;  %v5105_v19 = vld [vmem:[#allocation6 + $0x90] ss:$8 sps:$4 sm:$0xff]   ;;  %v5108_v27 = vld [vmem:[#allocation6 + $0x80] ss:$8 sps:$4 sm:$0xff]  }
 0x1f2   :  { %3464 = vmatprep.subr.bf16.mxu0 %v5077_v16  ;;  %3506 = vmatpush1.bf16.msra.mxu1 %v5120_v33  ;;  %v2743_v16 = vadd.f32 %v5588_v62, %v2700_v11  ;;  %v5159_v33 = vld [vmem:[#allocation9 + $0x70] ss:$8 sps:$4 sm:$0xff]   ;;  %v5194_v7 = vld [vmem:[#allocation9 + $0xc4] ss:$8 sps:$4 sm:$0xff]   ;;  %v5192_v11 = vld [vmem:[#allocation9 + $0xc0] ss:$8 sps:$4 sm:$0xff]  }
 0x1f3   :  { %3488 = vmatprep.mubr.bf16.mxu0 %v3057_v23  ;;  %3507 = vmatprep.subr.bf16.mxu1 %v5125_v35  ;;  %v2739_v18 = vadd.f32 %v5578_v51, %v2696_v40  ;;  %v5149_v51 = vld [vmem:[#allocation6 + $0x1b4] ss:$8 sps:$4 sm:$0xff]   ;;  %v5164_v35 = vld [vmem:[#allocation9 + $0x64] ss:$8 sps:$4 sm:$0xff]  }
 0x1f4   :  { %v2786_v41 = vadd.f32 %v5590_v63, %v2743_v16  ;;  %v5155_v63 = vld [vmem:[#allocation6 + $0x194] ss:$8 sps:$4 sm:$0xff]  }
 0x1f5   :  { %3465 = vmatpush1.bf16.msra.mxu0 %v5075_v24  ;;  %v2782_v23 = vadd.f32 %v5580_v52, %v2739_v18  ;;  %v5158_v52 = vld [vmem:[#allocation6 + $0x184] ss:$8 sps:$4 sm:$0xff]  }
 0x1f6   :  { %3466 = vmatprep.subr.bf16.mxu0 %v5080_v28  ;;  %3508 = vmatpush1.bf16.msra.mxu1 %v5123_v37  ;;  %v3052_v24 = vmax.f32 %v2786_v41, 0.0  ;;  %v5147_v28 = vld [vmem:[#allocation6 + $0x1b0] ss:$8 sps:$4 sm:$0xff]  }
 0x1f7   :  { %3509 = vmatprep.subr.bf16.mxu1 %v5128_v39  ;;  %v3048_v62 = vmax.f32 %v2782_v23, 0.0  ;;  %v5167_v37 = vld [vmem:[#allocation9 + $0x54] ss:$8 sps:$4 sm:$0xff]   ;;  %v5170_v39 = vld [vmem:[#allocation9 + $0x44] ss:$8 sps:$4 sm:$0xff]  }
 0x1f9   :  { %3467 = vmatpush1.bf16.msra.mxu0 %v5078_v30  ;;  %v3056_v25 = vpack.c.bf16 %v3052_v24, %v3048_v62  ;;  %v5150_v30 = vld [vmem:[#allocation6 + $0x1a0] ss:$8 sps:$4 sm:$0xff]  }
 0x1fa   :  { %3468 = vmatprep.subr.bf16.mxu0 %v5083_v32  ;;  %3510 = vmatpush1.bf16.msra.mxu1 %v5126_v43  ;;  %v5156_v32 = vld [vmem:[#allocation6 + $0x180] ss:$8 sps:$4 sm:$0xff]  }
 0x1fb   :  { %3511 = vmatprep.subr.bf16.mxu1 %v5131_v45  ;;  %v5173_v43 = vld [vmem:[#allocation9 + $0x34] ss:$8 sps:$4 sm:$0xff]   ;;  %v5176_v45 = vld [vmem:[#allocation9 + $0x24] ss:$8 sps:$4 sm:$0xff]  }
 0x1fd   :  { %3469 = vmatpush1.bf16.msra.mxu0 %v5081_v34  ;;  %v5161_v34 = vld [vmem:[#allocation9 + $0x74] ss:$8 sps:$4 sm:$0xff]  }
 0x1fe   :  { %3470 = vmatprep.subr.bf16.mxu0 %v5086_v36  ;;  %3512 = vmatpush1.bf16.msra.mxu1 %v5129_v48  ;;  %v5162_v36 = vld [vmem:[#allocation9 + $0x60] ss:$8 sps:$4 sm:$0xff]   ;;  %v5179_v48 = vld [vmem:[#allocation9 + $0x14] ss:$8 sps:$4 sm:$0xff]  }
 0x1ff   :  { %3513 = vmatprep.subr.bf16.mxu1 %v5134_v50  ;;  %v5182_v50 = vld [vmem:[#allocation9 + $0x4] ss:$8 sps:$4 sm:$0xff]  }
 0x201   :  { %3471 = vmatpush1.bf16.msra.mxu0 %v5084_v38  ;;  %v5165_v38 = vld [vmem:[#allocation9 + $0x50] ss:$8 sps:$4 sm:$0xff]  }
 0x202   :  { %3472 = vmatprep.subr.bf16.mxu0 %v5089_v42  ;;  %3514 = vmatpush1.bf16.msra.mxu1 %v5132_v55  ;;  %v5168_v42 = vld [vmem:[#allocation9 + $0x40] ss:$8 sps:$4 sm:$0xff]  }
 0x203   :  { %3515 = vmatprep.subr.bf16.mxu1 %v5137_v57  ;;  %v5183_v57 = vld [vmem:[#allocation9 + $0xf0] ss:$8 sps:$4 sm:$0xff]  }
 0x205   :  { %3473 = vmatpush2.bf16.msra.mxu0 %v5087_v44  ;;  %v5171_v44 = vld [vmem:[#allocation9 + $0x30] ss:$8 sps:$4 sm:$0xff]  }
 0x206   :  { %3474 = vmatprep.subr.bf16.mxu0 %v5092_v46  ;;  %3516 = vmatpush2.bf16.msra.mxu1 %v5135_v61  ;;  %v5174_v46 = vld [vmem:[#allocation9 + $0x20] ss:$8 sps:$4 sm:$0xff]  }
 0x207   :  { %3517 = vmatprep.subr.bf16.mxu1 %v5140_v3  ;;  %v5186_v61 = vld [vmem:[#allocation9 + $0xe0] ss:$8 sps:$4 sm:$0xff]  }
 0x209   :  { %3475 = vmatpush2.bf16.msra.mxu0 %v5090_v49  ;;  %v5177_v49 = vld [vmem:[#allocation9 + $0x10] ss:$8 sps:$4 sm:$0xff]  }
 0x20a   :  { %3476 = vmatprep.subr.bf16.mxu0 %v5095_v53  ;;  %3518 = vmatpush2.bf16.msra.mxu1 %v5138_v14  ;;  %v5180_v53 = vld [vmem:[#allocation9] ss:$8 sps:$4 sm:$0xff]   ;;  %v542_v14 = vsub.s32 2, %v5557_v13 }
 0x20b   :  { %3519 = vmatprep.subr.bf16.mxu1 %v5143_v0 }
 0x20d   :  { %3477 = vmatpush2.bf16.msra.mxu0 %v5093_v56 }
 0x20e   :  { %3478 = vmatprep.subr.bf16.mxu0 %v5098_v59  ;;  %3520 = vmatpush2.bf16.msra.mxu1 %v5141_v15  ;;  %v547_v15 = vrot.slane %v5566_v21, %v546_v6  ;;  %v5207_v6 = vld [vmem:[#allocation12 + $0x38] sm:$0xff]  }
 0x20f   :  { %3521 = vmatprep.subr.bf16.mxu1 %v5146_v1  ;;  %v543_v1 = vrot.slane %v5566_v21, %v542_v14  ;;  %v5208_v14 = vld [vmem:[#allocation12 + $0x30] sm:$0xff]  }
 0x211   :  { %3479 = vmatpush2.bf16.msra.mxu0 %v5096_v2  ;;  %v5191_v2 = vld [vmem:[#allocation9 + $0xd4] ss:$8 sps:$4 sm:$0xff]  }
 0x212   :  { %3480 = vmatprep.subr.bf16.mxu0 %v5101_v5  ;;  %3522 = vmatpush2.bf16.msra.mxu1 %v5144_v26  ;;  %v5189_v5 = vld [vmem:[#allocation9 + $0xd0] ss:$8 sps:$4 sm:$0xff]  }
 0x213   :  { %3523 = vmatprep.subr.bf16.mxu1 %v5149_v51 }
 0x215   :  { %3481 = vmatpush2.bf16.msra.mxu0 %v5099_v8 }
 0x216   :  { %3482 = vmatprep.subr.bf16.mxu0 %v5104_v10  ;;  %3524 = vmatpush2.bf16.msra.mxu1 %v5147_v28 }
 0x217   :  { %3525 = vmatprep.subr.bf16.mxu1 %v5152_v29 }
 0x219   :  { %3483 = vmatpush2.bf16.msra.mxu0 %v5102_v12  ;;  %v5197_v12 = vld [vmem:[#allocation9 + $0xb4] ss:$8 sps:$4 sm:$0xff]  }
 0x21a   :  { %3484 = vmatprep.subr.bf16.mxu0 %v5107_v17  ;;  %3526 = vmatpush2.bf16.msra.mxu1 %v5150_v30  ;;  %v5195_v17 = vld [vmem:[#allocation9 + $0xb0] ss:$8 sps:$4 sm:$0xff]  }
 0x21b   :  { %3527 = vmatprep.subr.bf16.mxu1 %v5155_v63 }
 0x21d   :  { %3485 = vmatpush2.bf16.msra.mxu0 %v5105_v19 }
 0x21e   :  { %3486 = vmatprep.subr.bf16.mxu0 %v5110_v22  ;;  %3528 = vmatpush2.bf16.msra.mxu1 %v5153_v31 }
 0x21f   :  { %3529 = vmatprep.subr.bf16.mxu1 %v5158_v52 }
 0x221   :  { %3487 = vmatpush2.bf16.msra.mxu0 %v5108_v27 }
 0x222   :  { %3530 = vmatpush2.bf16.msra.mxu1 %v5156_v32  ;;  %3752 = vmatprep.subr.bf16.mxu0 %v5161_v34 }
 0x224   :  { %3489 = vmatmul.mubr.bf16.vlgmr.msra.gmra.mxu0 %v3056_v25  ;;  %v2824_v55 = vpop.f32.mrf.mxu0 }
 0x225   :  { %3753 = vmatpush1.bf16.msra.mxu0 %v5159_v33  ;;  %v2867_v56 = vpop.f32.mrf.mxu1  ;;  %v2825_v26 = vadd.f32 %v2824_v55, %v543_v1 }
 0x226   :  { %3754 = vmatprep.subr.bf16.mxu0 %v5164_v35  ;;  %v2826_v59 = vpop.f32.mrf.mxu0 }
 0x227   :  { %v2869_v60 = vpop.f32.mrf.mxu1  ;;  %v2827_v18 = vadd.f32 %v2826_v59, %v547_v15  ;;  %v2868_v27 = vadd.f32 %v2867_v56, %v2825_v26 }
 0x228   :  { %v2828_v3 = vpop.f32.mrf.mxu0 }
 0x229   :  { %3755 = vmatpush1.bf16.msra.mxu0 %v5162_v36  ;;  %v2871_v4 = vpop.f32.mrf.mxu1  ;;  %v2829_v13 = vadd.f32 %v2828_v3, %v543_v1  ;;  %v2870_v22 = vadd.f32 %v2869_v60, %v2827_v18  ;;  %v5200_v60 = vld [vmem:[#allocation9 + $0xa4] ss:$8 sps:$4 sm:$0xff]   ;;  %v5201_v3 = vld [vmem:[#allocation9 + $0x90] ss:$8 sps:$4 sm:$0xff]  }
 0x22a   :  { %3756 = vmatprep.subr.bf16.mxu0 %v5167_v37  ;;  %v2830_v8 = vpop.f32.mrf.mxu0 }
 0x22b   :  { %v2873_v0 = vpop.f32.mrf.mxu1  ;;  %v2831_v23 = vadd.f32 %v2830_v8, %v547_v15  ;;  %v2872_v24 = vadd.f32 %v2871_v4, %v2829_v13  ;;  %v5206_v4 = vld [vmem:[#allocation9 + $0x84] ss:$8 sps:$4 sm:$0xff]   ;;  %v3124_v15 = vld [vmem:[#allocation7] sm:$0x3] }
 0x22c   :  { %v5209_v8 = vld [vmem:[#allocation12 + $0x28] sm:$0xff]   ;;  %v3133_v1 = vrot.slane %v3124_v15, %v5564_v20 }
 0x22d   :  { %3757 = vmatpush1.bf16.msra.mxu0 %v5165_v38  ;;  %v2874_v21 = vadd.f32 %v2873_v0, %v2831_v23  ;;  %v5210_v0 = vld [vmem:[#allocation12 + $0x20] sm:$0xff]  }
 0x22e   :  { %3758 = vmatprep.subr.bf16.mxu0 %v5170_v39 }
 0x231   :  { %3759 = vmatpush1.bf16.msra.mxu0 %v5168_v42 }
 0x232   :  { %3760 = vmatprep.subr.bf16.mxu0 %v5173_v43 }
 0x235   :  { %3761 = vmatpush1.bf16.msra.mxu0 %v5171_v44 }
 0x236   :  { %3762 = vmatprep.subr.bf16.mxu0 %v5176_v45 }
 0x239   :  { %3763 = vmatpush1.bf16.msra.mxu0 %v5174_v46 }
 0x23a   :  { %3764 = vmatprep.subr.bf16.mxu0 %v5179_v48 }
 0x23d   :  { %3765 = vmatpush1.bf16.msra.mxu0 %v5177_v49 }
 0x23e   :  { %3766 = vmatprep.subr.bf16.mxu0 %v5182_v50 }
 0x241   :  { %3767 = vmatpush1.bf16.msra.mxu0 %v5180_v53 }
 0x242   :  { %3768 = vmatprep.subr.bf16.mxu0 %v5185_v54 }
 0x245   :  { %3769 = vmatpush2.bf16.msra.mxu0 %v5183_v57 }
 0x246   :  { %3770 = vmatprep.subr.bf16.mxu0 %v5188_v58 }
 0x249   :  { %3771 = vmatpush2.bf16.msra.mxu0 %v5186_v61  ;;  %v5198_v61 = vld [vmem:[#allocation9 + $0xa0] ss:$8 sps:$4 sm:$0xff]  }
 0x24a   :  { %3772 = vmatprep.subr.bf16.mxu0 %v5191_v2  ;;  %v5203_v2 = vld [vmem:[#allocation9 + $0x94] ss:$8 sps:$4 sm:$0xff]  }
 0x24d   :  { %3773 = vmatpush2.bf16.msra.mxu0 %v5189_v5  ;;  %v5204_v5 = vld [vmem:[#allocation9 + $0x80] ss:$8 sps:$4 sm:$0xff]  }
 0x24e   :  { %3774 = vmatprep.subr.bf16.mxu0 %v5194_v7  ;;  %v5411_v7 = vmov 0.0  }
 0x24f   :  { %4433 = vmatprep.subr.bf16.mxu1 %v5411_v7 }
 0x251   :  { %3775 = vmatpush2.bf16.msra.mxu0 %v5192_v11 }
 0x252   :  { %3776 = vmatprep.subr.bf16.mxu0 %v5197_v12 }
 0x255   :  { %3777 = vmatpush2.bf16.msra.mxu0 %v5195_v17 }
 0x256   :  { %3778 = vmatprep.subr.bf16.mxu0 %v5200_v60 }
 0x259   :  { %3779 = vmatpush2.bf16.msra.mxu0 %v5198_v61 }
 0x25a   :  { %3780 = vmatprep.subr.bf16.mxu0 %v5203_v2 }
 0x25d   :  { %3781 = vmatpush2.bf16.msra.mxu0 %v5201_v3 }
 0x25e   :  { %3782 = vmatprep.subr.bf16.mxu0 %v5206_v4 }
 0x261   :  { %3783 = vmatpush2.bf16.msra.mxu0 %v5204_v5 }
 0x264   :  { %v2910_v9 = vpop.f32.mrf.mxu0 }
 0x265   :  { %v2953_v10 = vpop.f32.mrf.mxu1  ;;  %v2911_v25 = vadd.f32 %v2910_v9, %v2868_v27  ;;  %v5211_v9 = vld [vmem:[#allocation12 + $0x18] sm:$0xff]  }
 0x266   :  { %v2912_v40 = vpop.f32.mrf.mxu0 }
 0x267   :  { %v2955_v16 = vpop.f32.mrf.mxu1  ;;  %v2913_v62 = vadd.f32 %v2912_v40, %v2870_v22  ;;  %v2954_v32 = vadd.f32 %v2953_v10, %v2911_v25  ;;  %v3129_v40 = vrot.slane %v3124_v15, %v5593_v47 }
 0x268   :  { %v2914_v19 = vpop.f32.mrf.mxu0 }
 0x269   :  { %v2957_v41 = vpop.f32.mrf.mxu1  ;;  %v2915_v29 = vadd.f32 %v2914_v19, %v2872_v24  ;;  %v2956_v31 = vadd.f32 %v2955_v16, %v2913_v62 }
 0x26a   :  { %v2916_v51 = vpop.f32.mrf.mxu0 }
 0x26b   :  { %v2959_v28 = vpop.f32.mrf.mxu1  ;;  %v2917_v52 = vadd.f32 %v2916_v51, %v2874_v21  ;;  %v2958_v35 = vadd.f32 %v2957_v41, %v2915_v29 }
 0x26d   :  { %v2960_v42 = vadd.f32 %v2959_v28, %v2917_v52  ;;  %v5213_v52 = vld [vmem:[#allocation12 + $0x8] sm:$0xff]  }
 0x2a4   :  { %v2996_v30 = vpop.f32.mrf.mxu0 }
 0x2a5   :  { %v3039_v63 = vpop.f32.mrf.mxu1  ;;  %v2997_v37 = vadd.f32 %v2996_v30, %v2954_v32  ;;  %v5214_v32 = vld [vmem:[#allocation12] sm:$0xff]  }
 0x2a6   :  { %v2998_v33 = vpop.f32.mrf.mxu0 }
 0x2a7   :  { %v3041_v34 = vpop.f32.mrf.mxu1  ;;  %v2999_v36 = vadd.f32 %v2998_v33, %v2956_v31  ;;  %v3040_v49 = vadd.f32 %v3039_v63, %v2997_v37  ;;  %v5212_v31 = vld [vmem:[#allocation12 + $0x10] sm:$0xff]   ;;  %v3580_v33 = vld [vmem:[#allocation10] sm:$0x3] }
 0x2a8   :  { %v3000_v38 = vpop.f32.mrf.mxu0  ;;  %v3589_v37 = vrot.slane %v3580_v33, %v5564_v20 }
 0x2a9   :  { %v3043_v39 = vpop.f32.mrf.mxu1  ;;  %v3001_v43 = vadd.f32 %v3000_v38, %v2958_v35  ;;  %v3042_v45 = vadd.f32 %v3041_v34, %v2999_v36  ;;  %v3050_v57 = vmax.f32 %v3040_v49, 0.0  ;;  %v3585_v34 = vrot.slane %v3580_v33, %v5593_v47  ;;  %v4415_v49 = vld [vmem:[#allocation13] ss:$0 sm:$0xff] }
 0x2aa   :  { %v3002_v44 = vpop.f32.mrf.mxu0 }
 0x2ab   :  { %v3044_v46 = vadd.f32 %v3043_v39, %v3001_v43  ;;  %v3003_v48 = vadd.f32 %v3002_v44, %v2960_v42  ;;  %v3045_v50 = vpop.f32.mrf.mxu1  ;;  %v3051_v55 = vmax.f32 %v3042_v45, 0.0 }
 0x2ad   :  { %v3046_v53 = vadd.f32 %v3045_v50, %v3003_v48  ;;  %v3054_v54 = vmax.f32 %v3044_v46, 0.0 }
 0x2af   :  { %v3055_v56 = vmax.f32 %v3046_v53, 0.0  ;;  %v3058_v59 = vpack.c.bf16 %v3054_v54, %v3050_v57 }
 0x2b1   :  { %v3059_v58 = vpack.c.bf16 %v3055_v56, %v3051_v55 }
 0x2b3   :  { %3531 = vmatprep.mubr.bf16.mxu1 %v3059_v58 }
 0x2b4   :  { %3532 = vmatmul.mubr.bf16.vlgmr.msra.gmra.mxu1 %v3058_v59 }
 0x2b5   :  { %4434 = vmatpush3.bf16.msra.mxu1 %v5207_v6  ;;  %4449 = vmatprep.mubr.msk.bf16.mxu1 %vm5412_vm0, %v5411_v7 }
 0x2b6   :  { %4435 = vmatprep.subr.bf16.mxu1 %v5411_v7 }
 0x2b9   :  { %4436 = vmatpush3.bf16.msra.mxu1 %v5208_v14 }
 0x2ba   :  { %4437 = vmatprep.subr.bf16.mxu1 %v5411_v7 }
 0x2bd   :  { %4438 = vmatpush3.bf16.msra.mxu1 %v5209_v8 }
 0x2be   :  { %4439 = vmatprep.subr.bf16.mxu1 %v5411_v7 }
 0x2c1   :  { %4440 = vmatpush3.bf16.msra.mxu1 %v5210_v0 }
 0x2c2   :  { %4441 = vmatprep.subr.bf16.mxu1 %v5411_v7 }
 0x2c5   :  { %4442 = vmatpush3.bf16.msra.mxu1 %v5211_v9 }
 0x2c6   :  { %4443 = vmatprep.subr.bf16.mxu1 %v5411_v7 }
 0x2c9   :  { %4444 = vmatpush3.bf16.msra.mxu1 %v5212_v31 }
 0x2ca   :  { %4445 = vmatprep.subr.bf16.mxu1 %v5411_v7 }
 0x2cd   :  { %4446 = vmatpush3.bf16.msra.mxu1 %v5213_v52 }
 0x2ce   :  { %4447 = vmatprep.subr.bf16.mxu1 %v5411_v7 }
 0x2d1   :  { %4448 = vmatpush3.bf16.msra.mxu1 %v5214_v32 }
 0x2e4   :  { %v3490_v10 = vpop.f32.mrf.mxu0 }
 0x2e5   :  { %v3491_v19 = vadd.f32 %v3490_v10, %v3129_v40 }
 0x2e6   :  { %v3492_v11 = vpop.f32.mrf.mxu0 }
 0x2e7   :  { %v3493_v26 = vadd.f32 %v3492_v11, %v3133_v1 }
 0x2e8   :  { %v3494_v12 = vpop.f32.mrf.mxu0 }
 0x2e9   :  { %v3495_v13 = vadd.f32 %v3494_v12, %v3129_v40 }
 0x2ea   :  { %v3496_v17 = vpop.f32.mrf.mxu0 }
 0x2eb   :  { %v3497_v22 = vadd.f32 %v3496_v17, %v3133_v1 }
 0x374   :  { %v3533_v16 = vpop.f32.mrf.mxu1 }
 0x375   :  { %v3534_v24 = vadd.f32 %v3533_v16, %v3491_v19 }
 0x376   :  { %v3535_v18 = vpop.f32.mrf.mxu1 }
 0x377   :  { %v3536_v23 = vadd.f32 %v3535_v18, %v3493_v26  ;;  %v3542_v29 = vmax.f32 %v3534_v24, 0.0 }
 0x378   :  { %v3537_v41 = vpop.f32.mrf.mxu1 }
 0x379   :  { %v3538_v27 = vadd.f32 %v3537_v41, %v3495_v13  ;;  %v3543_v28 = vmax.f32 %v3536_v23, 0.0 }
 0x37a   :  { %v3539_v62 = vpop.f32.mrf.mxu1 }
 0x37b   :  { %v3540_v25 = vadd.f32 %v3539_v62, %v3497_v22  ;;  %v3544_v51 = vmax.f32 %v3538_v27, 0.0 }
 0x37d   :  { %v3545_v21 = vmax.f32 %v3540_v25, 0.0  ;;  %v3546_v63 = vpack.c.bf16 %v3544_v51, %v3542_v29 }
 0x37f   :  { %v3547_v30 = vpack.c.bf16 %v3545_v21, %v3543_v28 }
 0x381   :  { %3784 = vmatprep.mubr.bf16.mxu0 %v3547_v30 }
 0x382   :  { %3785 = vmatmul.mubr.bf16.vlgmr.msra.gmra.mxu0 %v3546_v63 }
 0x442   :  { %v3786_v35 = vpop.f32.mrf.mxu0 }
 0x443   :  { %v3787_v36 = vadd.f32 %v3786_v35, %v3585_v34 }
 0x444   :  { %v3788_v38 = vpop.f32.mrf.mxu0 }
 0x445   :  { %3910 = vst [vmem:[%s5638_s9] sm:$0xff] %v3787_v36  ;;  %v3789_v42 = vadd.f32 %v3788_v38, %v3589_v37 }
 0x446   :  { %v3790_v39 = vpop.f32.mrf.mxu0 }
 0x447   :  { %v3791_v43 = vadd.f32 %v3790_v39, %v3585_v34  ;;  %v3795_v46 = vmax.f32 %v3789_v42, 0.0 }
 0x448   :  { %v3792_v44 = vpop.f32.mrf.mxu0 }
 0x449   :  { %3912 = vst [vmem:[%s5638_s9 + $0x10] sm:$0xff] %v3791_v43  ;;  %v3793_v45 = vadd.f32 %v3792_v44, %v3589_v37 }
 0x44b   :  { %v3796_v47 = vmax.f32 %v3793_v45, 0.0 }
 0x44d   :  { %v3797_v48 = vpack.c.bf16 %v3796_v47, %v3795_v46 }
 0x44f   :  { %4450 = vmatmul.mubr.bf16.vlgmr.msra.gmra.mxu1 %v3797_v48 }
 0x50f   :  { %v3903_v20 = vpop.f32.mrf.mxu1 }
 0x510   :  { %v3904_v50 = vadd.f32 %v4415_v49, %v3903_v20 }
 0x511   :  { %v4451_v53 = vpop.f32.mrf.mxu1 }
 0x512   :  { %3911 = vst [vmem:[%s5638_s9 + $0x8] sm:$0xff] %v3904_v50 }
 0x513   :  { %v3906_v54 = vpop.f32.mrf.mxu1 }
 0x514   :  { %v3907_v55 = vadd.f32 %v4415_v49, %v3906_v54 }
 0x515   :  { %v4452_v56 = vpop.f32.mrf.mxu1 }
 0x516   :  { %3913 = vst [vmem:[%s5638_s9 + $0x18] sm:$0xff] %v3907_v55 }
 0x517   :  { %3918 = vsyncpa [#allocation3], 1 }
 0x518   :  { %3919 = vsyncpa [#allocation5], 1 }
 0x519   :  { %3920 = vsyncpa [#allocation8], 1 }
 0x51a   :  { %3921 = vsyncpa [#allocation11], 1 }
 0x51b   :  { %3922 = vsyncpa [#allocation14], 1 }

</bundles_post_ra>
